<compile_context>
chip_gen: v6e
topology: v6e:2x2x1
jax: 0.10.0
libtpu: 0.0.40
codegen_flags: <defaults>
</compile_context>

<pallas_src>
import jax
import jax.numpy as jnp
from jax.experimental import pallas as pl
from jax.experimental.pallas import tpu as pltpu

BN_EPS = 1e-5
LANE = 128


def _round_up(x, m):
    return (x + m - 1) // m * m


def _pick_m_tile(m, cap=1024):
    """Row tile (multiple of 8). If nothing <= cap divides m, return cap and
    let the caller pad M up to a multiple of it (padded rows are harmless)."""
    if m <= cap:
        return _round_up(m, 8)
    for t in range(cap, 7, -8):
        if m % t == 0:
            return t
    return cap


def _vmem_cap():
    # ~half of physical VMEM: 64 MiB on v5e/v6e (128 MiB phys), 32 MiB on v7x.
    try:
        cap = int(pltpu.get_tpu_info().vmem_capacity_bytes) // 2
    except Exception:
        cap = 48 << 20
    return int(min(max(cap, 24 << 20), 96 << 20))


def _compiler_params(stream_bytes, scratch_bytes=0):
    # double-buffered streamed blocks + in-kernel temporaries + slack
    need = 2 * int(stream_bytes) + int(scratch_bytes) + (2 << 20)
    limit = int(min(max(need, 16 << 20), _vmem_cap()))
    return pltpu.CompilerParams(
        dimension_semantics=("parallel", "parallel"),
        vmem_limit_bytes=limit,
    )


def _cout_tile(cp):
    # 256-wide Cout tiles fill the 256x256 MXU on v6e/v7x when cp allows.
    return 256 if cp % 256 == 0 else LANE


# ---------------------------------------------------------------------------
# Pallas kernels
# ---------------------------------------------------------------------------
def _matmul_kernel(a_ref, w_ref, o_ref):
    # (TM, Kp) @ (Kp, CT) -> (TM, CT); bf16 operands, f32 accumulate.
    o_ref[...] = jnp.dot(
        a_ref[...], w_ref[...], preferred_element_type=jnp.float32
    ).astype(o_ref.dtype)


def _conv_taps_stats(x, w, y_ref, s_ref):
    # x : (oh, ow, cin) bf16 (no halo);  w : (9*cin, co) bf16
    # y_ref : (1, oh, ow, co) bf16;      s_ref : (1, 2, co) f32
    oh, ow, cin = x.shape
    co = y_ref.shape[3]
    # zero halo built in VMEM (no HBM-side jnp.pad pass)
    zr = jnp.zeros((1, ow, cin), x.dtype)
    xp = jnp.concatenate([zr, x, zr], axis=0)                    # (oh+2, ow, cin)
    zc = jnp.zeros((oh + 2, 1, cin), x.dtype)
    xp = jnp.concatenate([zc, xp, zc], axis=1)                   # (oh+2, ow+2, cin)
    # gather the 9 taps once and issue ONE long-K matmul (K = 9*cin)
    cols = [xp[di:di + oh, dj:dj + ow, :].reshape(oh * ow, cin)
            for di in range(3) for dj in range(3)]
    a = jnp.concatenate(cols, axis=-1)                           # (oh*ow, 9*cin) bf16
    acc = jnp.dot(a, w, preferred_element_type=jnp.float32)      # (oh*ow, co) f32
    y_ref[0] = acc.reshape(oh, ow, co).astype(y_ref.dtype)
    s_ref[0] = jnp.concatenate(                                  # single (2, co) store
        [jnp.sum(acc, axis=0, keepdims=True),
         jnp.sum(acc * acc, axis=0, keepdims=True)], axis=0)


def _conv3x3_kernel(x_ref, w_ref, y_ref, s_ref):
    _conv_taps_stats(x_ref[0], w_ref[...], y_ref, s_ref)


def _conv3x3_bnrelu_kernel(x_ref, scale_ref, shift_ref, w_ref, y_ref, s_ref):
    # previous stage's BN (folded scale/shift) + ReLU fused onto the conv input
    cin = x_ref.shape[3]
    h = jnp.maximum(
        x_ref[0].astype(jnp.float32) * scale_ref[...].reshape(1, 1, cin)
        + shift_ref[...].reshape(1, 1, cin), 0.0).astype(jnp.bfloat16)
    _conv_taps_stats(h, w_ref[...], y_ref, s_ref)


def _bn_add_relu_kernel(y_ref, scale_ref, shift_ref, r_ref, o_ref):
    # o = ReLU(residual + y * scale + shift)   (f32 math, bf16 inputs)
    co = o_ref.shape[3]
    o_ref[0] = jnp.maximum(
        r_ref[0].astype(jnp.float32)
        + y_ref[0].astype(jnp.float32) * scale_ref[...].reshape(1, 1, co)
        + shift_ref[...].reshape(1, 1, co), 0.0).astype(o_ref.dtype)


# ---------------------------------------------------------------------------
# pallas_call wrappers (grid / BlockSpec plumbing)
# ---------------------------------------------------------------------------
def _scale_conv(patches_f32, w_scale_oihw, cp):
    m, k_raw = patches_f32.shape
    kp = _round_up(k_raw, 128 if k_raw >= 128 else 8)
    ct = _cout_tile(cp)
    tm = _pick_m_tile(m)
    m_pad = _round_up(m, tm)
    a = jnp.pad(patches_f32.astype(jnp.bfloat16),
                ((0, m_pad - m), (0, kp - k_raw)))
    w = _pack_scale_weight(w_scale_oihw, kp, cp)
    grid = (m_pad // tm, cp // ct)
    stream = tm * kp * 2 + kp * ct * 2 + tm * ct * 2
    out = pl.pallas_call(
        _matmul_kernel,
        out_shape=jax.ShapeDtypeStruct((m_pad, cp), jnp.bfloat16),
        grid=grid,
        in_specs=[pl.BlockSpec((tm, kp), lambda i, j: (i, 0)),
                  pl.BlockSpec((kp, ct), lambda i, j: (0, j))],
        out_specs=pl.BlockSpec((tm, ct), lambda i, j: (i, j)),
        compiler_params=_compiler_params(stream, tm * ct * 4),
    )(a, w)
    return out[:m]


def _conv3x3_bn_stats(x_bf16, w_bf16, scale=None, shift=None):
    n, oh, ow, cin_p = x_bf16.shape
    k9, cp = w_bf16.shape
    ct = _cout_tile(cp)
    nc = cp // ct

    w_blk = k9 * ct * 2
    x_blk = oh * ow * cin_p * 2
    y_blk = oh * ow * ct * 2
    if w_blk > x_blk:
        # weight tile is the larger operand: keep it resident across the batch
        grid = (nc, n)
        x_map = lambda c, b: (b, 0, 0, 0)
        w_map = lambda c, b: (0, c)
        v_map = lambda c, b: (0, 0)
        y_map = lambda c, b: (b, 0, 0, c)
        st_map = lambda c, b: (b, 0, c)
    else:
        grid = (n, nc)
        x_map = lambda b, c: (b, 0, 0, 0)
        w_map = lambda b, c: (0, c)
        v_map = lambda b, c: (0, 0)
        y_map = lambda b, c: (b, 0, 0, c)
        st_map = lambda b, c: (b, 0, c)

    in_specs = [pl.BlockSpec((1, oh, ow, cin_p), x_map)]
    ins = [x_bf16]
    if scale is not None:
        in_specs += [pl.BlockSpec((1, cin_p), v_map),
                     pl.BlockSpec((1, cin_p), v_map)]
        ins += [scale, shift]
    in_specs += [pl.BlockSpec((k9, ct), w_map)]
    ins += [w_bf16]

    kernel = _conv3x3_bnrelu_kernel if scale is not None else _conv3x3_kernel

    stream = x_blk + w_blk + y_blk + 2 * ct * 4 + 2 * cin_p * 4
    scratch = (oh * ow * cin_p * (4 + 2)            # fused BN f32/bf16 copies
               + (oh + 2) * (ow + 2) * cin_p * 2    # in-kernel zero halo
               + 2 * oh * ow * 9 * cin_p * 2        # tap slices + im2col concat
               + oh * ow * ct * 4)                  # f32 accumulator

    return pl.pallas_call(
        kernel,
        out_shape=(jax.ShapeDtypeStruct((n, oh, ow, cp), jnp.bfloat16),
                   jax.ShapeDtypeStruct((n, 2, cp), jnp.float32)),
        grid=grid,
        in_specs=in_specs,
        out_specs=(pl.BlockSpec((1, oh, ow, ct), y_map),
                   pl.BlockSpec((1, 2, ct), st_map)),
        compiler_params=_compiler_params(stream, scratch),
    )(*ins)


def _bn_add_relu(y_bf16, scale, shift, r_bf16, out_dtype=jnp.float32):
    n, oh, ow, cp = y_bf16.shape
    ct = _cout_tile(cp)
    grid = (n, cp // ct)
    blk = pl.BlockSpec((1, oh, ow, ct), lambda b, c: (b, 0, 0, c))
    vec = pl.BlockSpec((1, ct), lambda b, c: (0, c))
    stream = oh * ow * ct * (2 + 2 + 4) + 2 * ct * 4
    return pl.pallas_call(
        _bn_add_relu_kernel,
        out_shape=jax.ShapeDtypeStruct((n, oh, ow, cp), out_dtype),
        grid=grid,
        in_specs=[blk, vec, vec, blk],
        out_specs=blk,
        compiler_params=_compiler_params(stream, oh * ow * ct * 8),
    )(y_bf16, scale, shift, r_bf16)


# ---------------------------------------------------------------------------
# JAX glue: im2col (stride-2 scale conv only), weight packing, BN fold
# ---------------------------------------------------------------------------
def _im2col_s2(x_nhwc):
    # 3x3 / stride 2 / pad 1 patch matrix for the "scale" conv.
    n, h, w, c = x_nhwc.shape
    xp = jnp.pad(x_nhwc, ((0, 0), (1, 1), (1, 1), (0, 0)))
    oh = (h - 1) // 2 + 1
    ow = (w - 1) // 2 + 1
    cols = []
    for i in range(3):
        for j in range(3):
            cols.append(xp[:, i:i + 2 * oh:2, j:j + 2 * ow:2, :])
    patches = jnp.concatenate(cols, axis=-1)              # (N, OH, OW, 9*C)
    return patches.reshape(n * oh * ow, 9 * c), (n, oh, ow)


def _pack_scale_weight(w_oihw, kp, cp):
    cout, cin, kh, kw = w_oihw.shape
    w = jnp.transpose(w_oihw, (2, 3, 1, 0)).reshape(kh * kw * cin, cout)
    return jnp.pad(w, ((0, kp - kh * kw * cin), (0, cp - cout))).astype(jnp.bfloat16)


def _pack_block_weight(w_oihw, cp):
    cout, cin, kh, kw = w_oihw.shape
    w = jnp.transpose(w_oihw, (2, 3, 1, 0))               # (3, 3, Cin, Cout)
    w = jnp.pad(w, ((0, 0), (0, 0), (0, cp - cin), (0, cp - cout)))
    return w.reshape(kh * kw * cp, cp).astype(jnp.bfloat16)


def _bn_fold(stats, gamma, beta, m_total, cp):
    # stats: (N, 2, Cp) per-image (sum, sumsq) -> per-channel scale/shift.
    s = jnp.sum(stats[:, 0, :], axis=0)
    sq = jnp.sum(stats[:, 1, :], axis=0)
    mean = s / m_total
    var = jnp.maximum(sq / m_total - mean * mean, 0.0)    # biased (train-mode) var
    g = jnp.pad(gamma.astype(jnp.float32), (0, cp - gamma.shape[0]))
    b = jnp.pad(beta.astype(jnp.float32), (0, cp - beta.shape[0]))
    scale = g * jax.lax.rsqrt(var + BN_EPS)
    shift = b - mean * scale
    return scale.reshape(1, cp), shift.reshape(1, cp)


# ---------------------------------------------------------------------------
# ResBlock forward
# ---------------------------------------------------------------------------
def res_block_forward(x_nchw, params):
    w_scale, w1, w2 = params["w_scale"], params["w1"], params["w2"]
    out_nc = w_scale.shape[0]
    cp = _round_up(out_nc, LANE)

    x_nhwc = jnp.transpose(x_nchw, (0, 2, 3, 1)).astype(jnp.float32)

    # ---- stage 1: scale conv (3x3, stride 2, pad 1, no bias) -> bf16 residual
    # TODO(synk): the stride-2 tap gather (im2col) stays in JAX glue; only the
    # lane-dense MXU matmul runs in a Pallas kernel for this stage.
    patches, (n, oh, ow) = _im2col_s2(x_nhwc)
    m = n * oh * ow
    residual = _scale_conv(patches, w_scale, cp).reshape(n, oh, ow, cp)

    # ---- stage 2: conv1 + per-image BN1 stats (fused), bf16 output ----------
    y1, st1 = _conv3x3_bn_stats(residual, _pack_block_weight(w1, cp))
    sc1, sh1 = _bn_fold(st1, params["gamma1"], params["beta1"], m, cp)

    # ---- stage 3: conv2 with BN1+ReLU fused onto its input, + BN2 stats -----
    y2, st2 = _conv3x3_bn_stats(y1, _pack_block_weight(w2, cp),
                                scale=sc1, shift=sh1)
    sc2, sh2 = _bn_fold(st2, params["gamma2"], params["beta2"], m, cp)

    # ---- stage 4: out = ReLU(residual + BN2(y2)) -----------------------------
    out = _bn_add_relu(y2, sc2, sh2, residual)            # (n, oh, ow, cp) f32
    return jnp.transpose(out[:, :, :, :out_nc], (0, 3, 1, 2))   # back to NCHW


def init_params(key, in_nc, out_nc):
    ks = jax.random.split(key, 7)
    return {
        "w_scale": 0.1 * jax.random.normal(ks[0], (out_nc, in_nc, 3, 3), jnp.float32),
        "w1": 0.1 * jax.random.normal(ks[1], (out_nc, out_nc, 3, 3), jnp.float32),
        "w2": 0.1 * jax.random.normal(ks[2], (out_nc, out_nc, 3, 3), jnp.float32),
        "gamma1": 1.0 + 0.05 * jax.random.normal(ks[3], (out_nc,), jnp.float32),
        "beta1": 0.05 * jax.random.normal(ks[4], (out_nc,), jnp.float32),
        "gamma2": 1.0 + 0.05 * jax.random.normal(ks[5], (out_nc,), jnp.float32),
        "beta2": 0.05 * jax.random.normal(ks[6], (out_nc,), jnp.float32),
    }


def _reference_forward(x, p):
    # Pure-JAX f32 reference of the PyTorch module (train-mode BN).
    prec = jax.lax.Precision.HIGHEST

    def conv(inp, w, stride):
        return jax.lax.conv_general_dilated(
            inp, w, (stride, stride), ((1, 1), (1, 1)),
            dimension_numbers=("NCHW", "OIHW", "NCHW"), precision=prec)

    def bn(y, g, b):
        mean = jnp.mean(y, axis=(0, 2, 3), keepdims=True)
        var = jnp.mean((y - mean) ** 2, axis=(0, 2, 3), keepdims=True)
        yn = (y - mean) * jax.lax.rsqrt(var + BN_EPS)
        return yn * g.reshape(1, -1, 1, 1) + b.reshape(1, -1, 1, 1)

    res = conv(x, p["w_scale"], 2)
    h = jax.nn.relu(bn(conv(res, p["w1"], 1), p["gamma1"], p["beta1"]))
    y = bn(conv(h, p["w2"], 1), p["gamma2"], p["beta2"])
    return jax.nn.relu(res + y)


if __name__ == "__main__":
    key = jax.random.PRNGKey(0)
    kx, kparam = jax.random.split(key)

    N, IN_NC, OUT_NC, H, W = 2, 4, 8, 16, 16
    x = jax.random.normal(kx, (N, IN_NC, H, W), jnp.float32)   # NCHW like PyTorch
    params = init_params(kparam, IN_NC, OUT_NC)

    out = jax.jit(res_block_forward)(x, params)
    out = jax.block_until_ready(out)

    assert out.shape == (N, OUT_NC, H // 2, W // 2), out.shape
    assert bool(jnp.all(out >= 0.0))                # final ReLU

    # correctness vs pure-JAX f32 reference (loose tol: bf16 MXU operands/storage)
    ref = _reference_forward(x, params)
    max_err = float(jnp.max(jnp.abs(out - ref)))
    assert max_err < 0.2, max_err

    print("KERNEL_OK")
</pallas_src>

<mosaic_0001>
module attributes {stable_mosaic.version = 11 : i64} {
  func.func @_matmul_kernel(%arg0: i32, %arg1: i32, %arg2: memref<128x40xbf16, #tpu.memory_space<vmem>>, %arg3: memref<40x128xbf16, #tpu.memory_space<vmem>>, %arg4: memref<128x128xbf16, #tpu.memory_space<vmem>>) attributes {dimension_semantics = [#tpu.dimension_semantics<parallel>, #tpu.dimension_semantics<parallel>], iteration_bounds = array<i64: 1, 1>, scalar_prefetch = 0 : i64, scratch_operands = 0 : i64, tpu.core_type = #tpu.core_type<tc>, window_params = [{transform_indices = @transform_0, window_bounds = array<i64: 128, 40>}, {transform_indices = @transform_1, window_bounds = array<i64: 40, 128>}, {transform_indices = @transform_2, window_bounds = array<i64: 128, 128>}]} {
    %c0 = arith.constant 0 : index
    %c0_0 = arith.constant 0 : index
    %0 = vector.load %arg2[%c0, %c0_0] : memref<128x40xbf16, #tpu.memory_space<vmem>>, vector<128x40xbf16>
    %c0_1 = arith.constant 0 : index
    %c0_2 = arith.constant 0 : index
    %1 = vector.load %arg3[%c0_1, %c0_2] : memref<40x128xbf16, #tpu.memory_space<vmem>>, vector<40x128xbf16>
    %cst = arith.constant dense<0.000000e+00> : vector<128x128xf32>
    %2 = tpu.matmul %0, %1, %cst {dimension_numbers = #tpu.dot_dimension_numbers<[1], [0], [0], [1], [0, 0, 1, 1], [], []>} : vector<128x40xbf16>, vector<40x128xbf16>, vector<128x128xf32> -> vector<128x128xf32>
    %3 = arith.truncf %2 : vector<128x128xf32> to vector<128x128xbf16>
    %c0_3 = arith.constant 0 : index
    %c0_4 = arith.constant 0 : index
    %4 = vector.load %arg4[%c0_3, %c0_4] : memref<128x128xbf16, #tpu.memory_space<vmem>>, vector<128x128xbf16>
    tpu.vector_store %arg4[%c0_3, %c0_4], %3 {strides = array<i32>} : memref<128x128xbf16, #tpu.memory_space<vmem>>, vector<128x128xbf16>,
    return
  }
  func.func @transform_0(%arg0: i32, %arg1: i32) -> (i32, i32) {
    %c0_i32 = arith.constant 0 : i32
    %c0_i32_0 = arith.constant 0 : i32
    return %arg0, %c0_i32 : i32, i32
  }
  func.func @transform_1(%arg0: i32, %arg1: i32) -> (i32, i32) {
    %c0_i32 = arith.constant 0 : i32
    %c0_i32_0 = arith.constant 0 : i32
    return %c0_i32, %arg1 : i32, i32
  }
  func.func @transform_2(%arg0: i32, %arg1: i32) -> (i32, i32) {
    %c0_i32 = arith.constant 0 : i32
    return %arg0, %arg1 : i32, i32
  }
}

module attributes {stable_mosaic.version = 11 : i64} {
  func.func @_conv3x3_kernel(%arg0: i32, %arg1: i32, %arg2: memref<1x8x8x128xbf16, #tpu.memory_space<vmem>>, %arg3: memref<1152x128xbf16, #tpu.memory_space<vmem>>, %arg4: memref<1x8x8x128xbf16, #tpu.memory_space<vmem>>, %arg5: memref<1x2x128xf32, #tpu.memory_space<vmem>>) attributes {dimension_semantics = [#tpu.dimension_semantics<parallel>, #tpu.dimension_semantics<parallel>], iteration_bounds = array<i64: 1, 2>, scalar_prefetch = 0 : i64, scratch_operands = 0 : i64, tpu.core_type = #tpu.core_type<tc>, window_params = [{transform_indices = @transform_0, window_bounds = array<i64: 1, 8, 8, 128>}, {transform_indices = @transform_1, window_bounds = array<i64: 1152, 128>}, {transform_indices = @transform_2, window_bounds = array<i64: 1, 8, 8, 128>}, {transform_indices = @transform_3, window_bounds = array<i64: 1, 2, 128>}]} {
    %c0 = arith.constant 0 : index
    %c0_0 = arith.constant 0 : index
    %c0_1 = arith.constant 0 : index
    %c0_2 = arith.constant 0 : index
    %0 = vector.load %arg2[%c0, %c0_0, %c0_1, %c0_2] : memref<1x8x8x128xbf16, #tpu.memory_space<vmem>>, vector<1x8x8x128xbf16>
    %1 = vector.shape_cast %0 : vector<1x8x8x128xbf16> to vector<8x8x128xbf16>
    %c0_3 = arith.constant 0 : index
    %c0_4 = arith.constant 0 : index
    %2 = vector.load %arg3[%c0_3, %c0_4] : memref<1152x128xbf16, #tpu.memory_space<vmem>>, vector<1152x128xbf16>
    %cst = arith.constant 0.000000e+00 : bf16
    %3 = vector.broadcast %cst : bf16 to vector<1x8x128xbf16>
    %4 = tpu.concatenate %3, %1, %3 in 0 : vector<1x8x128xbf16>, vector<8x8x128xbf16>, vector<1x8x128xbf16> -> vector<10x8x128xbf16>
    %cst_5 = arith.constant 0.000000e+00 : bf16
    %5 = vector.broadcast %cst_5 : bf16 to vector<10x1x128xbf16>
    %6 = tpu.concatenate %5, %4, %5 in 1 : vector<10x1x128xbf16>, vector<10x8x128xbf16>, vector<10x1x128xbf16> -> vector<10x10x128xbf16>
    %7 = vector.extract_strided_slice %6 {offsets = [0, 0, 0], sizes = [8, 8, 128], strides = [1, 1, 1]} : vector<10x10x128xbf16> to vector<8x8x128xbf16>
    %8 = vector.shape_cast %7 : vector<8x8x128xbf16> to vector<64x128xbf16>
    %9 = vector.extract_strided_slice %6 {offsets = [0, 1, 0], sizes = [8, 8, 128], strides = [1, 1, 1]} : vector<10x10x128xbf16> to vector<8x8x128xbf16>
    %10 = vector.shape_cast %9 : vector<8x8x128xbf16> to vector<64x128xbf16>
    %11 = vector.extract_strided_slice %6 {offsets = [0, 2, 0], sizes = [8, 8, 128], strides = [1, 1, 1]} : vector<10x10x128xbf16> to vector<8x8x128xbf16>
    %12 = vector.shape_cast %11 : vector<8x8x128xbf16> to vector<64x128xbf16>
    %13 = vector.extract_strided_slice %6 {offsets = [1, 0, 0], sizes = [8, 8, 128], strides = [1, 1, 1]} : vector<10x10x128xbf16> to vector<8x8x128xbf16>
    %14 = vector.shape_cast %13 : vector<8x8x128xbf16> to vector<64x128xbf16>
    %15 = vector.extract_strided_slice %6 {offsets = [1, 1, 0], sizes = [8, 8, 128], strides = [1, 1, 1]} : vector<10x10x128xbf16> to vector<8x8x128xbf16>
    %16 = vector.shape_cast %15 : vector<8x8x128xbf16> to vector<64x128xbf16>
    %17 = vector.extract_strided_slice %6 {offsets = [1, 2, 0], sizes = [8, 8, 128], strides = [1, 1, 1]} : vector<10x10x128xbf16> to vector<8x8x128xbf16>
    %18 = vector.shape_cast %17 : vector<8x8x128xbf16> to vector<64x128xbf16>
    %19 = vector.extract_strided_slice %6 {offsets = [2, 0, 0], sizes = [8, 8, 128], strides = [1, 1, 1]} : vector<10x10x128xbf16> to vector<8x8x128xbf16>
    %20 = vector.shape_cast %19 : vector<8x8x128xbf16> to vector<64x128xbf16>
    %21 = vector.extract_strided_slice %6 {offsets = [2, 1, 0], sizes = [8, 8, 128], strides = [1, 1, 1]} : vector<10x10x128xbf16> to vector<8x8x128xbf16>
    %22 = vector.shape_cast %21 : vector<8x8x128xbf16> to vector<64x128xbf16>
    %23 = vector.extract_strided_slice %6 {offsets = [2, 2, 0], sizes = [8, 8, 128], strides = [1, 1, 1]} : vector<10x10x128xbf16> to vector<8x8x128xbf16>
    %24 = vector.shape_cast %23 : vector<8x8x128xbf16> to vector<64x128xbf16>
    %25 = tpu.concatenate %8, %10, %12, %14, %16, %18, %20, %22, %24 in 1 : vector<64x128xbf16>, vector<64x128xbf16>, vector<64x128xbf16>, vector<64x128xbf16>, vector<64x128xbf16>, vector<64x128xbf16>, vector<64x128xbf16>, vector<64x128xbf16>, vector<64x128xbf16> -> vector<64x1152xbf16>
    %cst_6 = arith.constant dense<0.000000e+00> : vector<64x128xf32>
    %26 = tpu.matmul %25, %2, %cst_6 {dimension_numbers = #tpu.dot_dimension_numbers<[1], [0], [0], [1], [0, 0, 1, 1], [], []>} : vector<64x1152xbf16>, vector<1152x128xbf16>, vector<64x128xf32> -> vector<64x128xf32>
    %27 = vector.shape_cast %26 : vector<64x128xf32> to vector<8x8x128xf32>
    %28 = arith.truncf %27 : vector<8x8x128xf32> to vector<8x8x128xbf16>
    %c0_7 = arith.constant 0 : index
    %c0_8 = arith.constant 0 : index
    %c0_9 = arith.constant 0 : index
    %c0_10 = arith.constant 0 : index
    %29 = vector.load %arg4[%c0_7, %c0_8, %c0_9, %c0_10] : memref<1x8x8x128xbf16, #tpu.memory_space<vmem>>, vector<1x8x8x128xbf16>
    %30 = vector.shape_cast %29 : vector<1x8x8x128xbf16> to vector<8x8x128xbf16>
    %31 = vector.shape_cast %28 : vector<8x8x128xbf16> to vector<1x8x8x128xbf16>
    tpu.vector_store %arg4[%c0_7, %c0_8, %c0_9, %c0_10], %31 {strides = array<i32>} : memref<1x8x8x128xbf16, #tpu.memory_space<vmem>>, vector<1x8x8x128xbf16>,
    %cst_11 = arith.constant dense<0.000000e+00> : vector<128xf32>
    %32 = vector.multi_reduction <add>, %26, %cst_11 [0] : vector<64x128xf32> to vector<128xf32>
    %33 = vector.shape_cast %32 : vector<128xf32> to vector<1x128xf32>
    %34 = arith.mulf %26, %26 : vector<64x128xf32>
    %cst_12 = arith.constant dense<0.000000e+00> : vector<128xf32>
    %35 = vector.multi_reduction <add>, %34, %cst_12 [0] : vector<64x128xf32> to vector<128xf32>
    %36 = vector.shape_cast %35 : vector<128xf32> to vector<1x128xf32>
    %37 = tpu.concatenate %33, %36 in 0 : vector<1x128xf32>, vector<1x128xf32> -> vector<2x128xf32>
    %c0_13 = arith.constant 0 : index
    %c0_14 = arith.constant 0 : index
    %c0_15 = arith.constant 0 : index
    %38 = vector.load %arg5[%c0_13, %c0_14, %c0_15] : memref<1x2x128xf32, #tpu.memory_space<vmem>>, vector<1x2x128xf32>
    %39 = vector.shape_cast %38 : vector<1x2x128xf32> to vector<2x128xf32>
    %40 = vector.shape_cast %37 : vector<2x128xf32> to vector<1x2x128xf32>
    tpu.vector_store %arg5[%c0_13, %c0_14, %c0_15], %40 {strides = array<i32>} : memref<1x2x128xf32, #tpu.memory_space<vmem>>, vector<1x2x128xf32>,
    return
  }
  func.func @transform_0(%arg0: i32, %arg1: i32) -> (i32, i32, i32, i32) {
    %c0_i32 = arith.constant 0 : i32
    %c0_i32_0 = arith.constant 0 : i32
    %c0_i32_1 = arith.constant 0 : i32
    %c0_i32_2 = arith.constant 0 : i32
    return %arg1, %c0_i32, %c0_i32_0, %c0_i32_1 : i32, i32, i32, i32
  }
  func.func @transform_1(%arg0: i32, %arg1: i32) -> (i32, i32) {
    %c0_i32 = arith.constant 0 : i32
    %c0_i32_0 = arith.constant 0 : i32
    return %c0_i32, %arg0 : i32, i32
  }
  func.func @transform_2(%arg0: i32, %arg1: i32) -> (i32, i32, i32, i32) {
    %c0_i32 = arith.constant 0 : i32
    %c0_i32_0 = arith.constant 0 : i32
    %c0_i32_1 = arith.constant 0 : i32
    return %arg1, %c0_i32, %c0_i32_0, %arg0 : i32, i32, i32, i32
  }
  func.func @transform_3(%arg0: i32, %arg1: i32) -> (i32, i32, i32) {
    %c0_i32 = arith.constant 0 : i32
    %c0_i32_0 = arith.constant 0 : i32
    return %arg1, %c0_i32, %arg0 : i32, i32, i32
  }
}

module attributes {stable_mosaic.version = 11 : i64} {
  func.func @_conv3x3_bnrelu_kernel(%arg0: i32, %arg1: i32, %arg2: memref<1x8x8x128xbf16, #tpu.memory_space<vmem>>, %arg3: memref<1x128xf32, #tpu.memory_space<vmem>>, %arg4: memref<1x128xf32, #tpu.memory_space<vmem>>, %arg5: memref<1152x128xbf16, #tpu.memory_space<vmem>>, %arg6: memref<1x8x8x128xbf16, #tpu.memory_space<vmem>>, %arg7: memref<1x2x128xf32, #tpu.memory_space<vmem>>) attributes {dimension_semantics = [#tpu.dimension_semantics<parallel>, #tpu.dimension_semantics<parallel>], iteration_bounds = array<i64: 1, 2>, scalar_prefetch = 0 : i64, scratch_operands = 0 : i64, tpu.core_type = #tpu.core_type<tc>, window_params = [{transform_indices = @transform_0, window_bounds = array<i64: 1, 8, 8, 128>}, {pipeline_mode = #tpu.pipeline_mode<synchronous>, transform_indices = @transform_1, window_bounds = array<i64: 1, 128>}, {pipeline_mode = #tpu.pipeline_mode<synchronous>, transform_indices = @transform_2, window_bounds = array<i64: 1, 128>}, {transform_indices = @transform_3, window_bounds = array<i64: 1152, 128>}, {transform_indices = @transform_4, window_bounds = array<i64: 1, 8, 8, 128>}, {transform_indices = @transform_5, window_bounds = array<i64: 1, 2, 128>}]} {
    %c0 = arith.constant 0 : index
    %c0_0 = arith.constant 0 : index
    %c0_1 = arith.constant 0 : index
    %c0_2 = arith.constant 0 : index
    %0 = vector.load %arg2[%c0, %c0_0, %c0_1, %c0_2] : memref<1x8x8x128xbf16, #tpu.memory_space<vmem>>, vector<1x8x8x128xbf16>
    %1 = vector.shape_cast %0 : vector<1x8x8x128xbf16> to vector<8x8x128xbf16>
    %2 = arith.extf %1 : vector<8x8x128xbf16> to vector<8x8x128xf32>
    %c0_3 = arith.constant 0 : index
    %c0_4 = arith.constant 0 : index
    %3 = vector.load %arg3[%c0_3, %c0_4] : memref<1x128xf32, #tpu.memory_space<vmem>>, vector<1x128xf32>
    %4 = vector.shape_cast %3 : vector<1x128xf32> to vector<1x1x128xf32>
    %5 = vector.broadcast %4 : vector<1x1x128xf32> to vector<8x8x128xf32>
    %6 = arith.mulf %2, %5 : vector<8x8x128xf32>
    %c0_5 = arith.constant 0 : index
    %c0_6 = arith.constant 0 : index
    %7 = vector.load %arg4[%c0_5, %c0_6] : memref<1x128xf32, #tpu.memory_space<vmem>>, vector<1x128xf32>
    %8 = vector.shape_cast %7 : vector<1x128xf32> to vector<1x1x128xf32>
    %9 = vector.broadcast %8 : vector<1x1x128xf32> to vector<8x8x128xf32>
    %10 = arith.addf %6, %9 : vector<8x8x128xf32>
    %cst = arith.constant 0.000000e+00 : f32
    %11 = vector.broadcast %cst : f32 to vector<8x8x128xf32>
    %12 = arith.maximumf %10, %11 : vector<8x8x128xf32>
    %13 = arith.truncf %12 : vector<8x8x128xf32> to vector<8x8x128xbf16>
    %c0_7 = arith.constant 0 : index
    %c0_8 = arith.constant 0 : index
    %14 = vector.load %arg5[%c0_7, %c0_8] : memref<1152x128xbf16, #tpu.memory_space<vmem>>, vector<1152x128xbf16>
    %cst_9 = arith.constant 0.000000e+00 : bf16
    %15 = vector.broadcast %cst_9 : bf16 to vector<1x8x128xbf16>
    %16 = tpu.concatenate %15, %13, %15 in 0 : vector<1x8x128xbf16>, vector<8x8x128xbf16>, vector<1x8x128xbf16> -> vector<10x8x128xbf16>
    %cst_10 = arith.constant 0.000000e+00 : bf16
    %17 = vector.broadcast %cst_10 : bf16 to vector<10x1x128xbf16>
    %18 = tpu.concatenate %17, %16, %17 in 1 : vector<10x1x128xbf16>, vector<10x8x128xbf16>, vector<10x1x128xbf16> -> vector<10x10x128xbf16>
    %19 = vector.extract_strided_slice %18 {offsets = [0, 0, 0], sizes = [8, 8, 128], strides = [1, 1, 1]} : vector<10x10x128xbf16> to vector<8x8x128xbf16>
    %20 = vector.shape_cast %19 : vector<8x8x128xbf16> to vector<64x128xbf16>
    %21 = vector.extract_strided_slice %18 {offsets = [0, 1, 0], sizes = [8, 8, 128], strides = [1, 1, 1]} : vector<10x10x128xbf16> to vector<8x8x128xbf16>
    %22 = vector.shape_cast %21 : vector<8x8x128xbf16> to vector<64x128xbf16>
    %23 = vector.extract_strided_slice %18 {offsets = [0, 2, 0], sizes = [8, 8, 128], strides = [1, 1, 1]} : vector<10x10x128xbf16> to vector<8x8x128xbf16>
    %24 = vector.shape_cast %23 : vector<8x8x128xbf16> to vector<64x128xbf16>
    %25 = vector.extract_strided_slice %18 {offsets = [1, 0, 0], sizes = [8, 8, 128], strides = [1, 1, 1]} : vector<10x10x128xbf16> to vector<8x8x128xbf16>
    %26 = vector.shape_cast %25 : vector<8x8x128xbf16> to vector<64x128xbf16>
    %27 = vector.extract_strided_slice %18 {offsets = [1, 1, 0], sizes = [8, 8, 128], strides = [1, 1, 1]} : vector<10x10x128xbf16> to vector<8x8x128xbf16>
    %28 = vector.shape_cast %27 : vector<8x8x128xbf16> to vector<64x128xbf16>
    %29 = vector.extract_strided_slice %18 {offsets = [1, 2, 0], sizes = [8, 8, 128], strides = [1, 1, 1]} : vector<10x10x128xbf16> to vector<8x8x128xbf16>
    %30 = vector.shape_cast %29 : vector<8x8x128xbf16> to vector<64x128xbf16>
    %31 = vector.extract_strided_slice %18 {offsets = [2, 0, 0], sizes = [8, 8, 128], strides = [1, 1, 1]} : vector<10x10x128xbf16> to vector<8x8x128xbf16>
    %32 = vector.shape_cast %31 : vector<8x8x128xbf16> to vector<64x128xbf16>
    %33 = vector.extract_strided_slice %18 {offsets = [2, 1, 0], sizes = [8, 8, 128], strides = [1, 1, 1]} : vector<10x10x128xbf16> to vector<8x8x128xbf16>
    %34 = vector.shape_cast %33 : vector<8x8x128xbf16> to vector<64x128xbf16>
    %35 = vector.extract_strided_slice %18 {offsets = [2, 2, 0], sizes = [8, 8, 128], strides = [1, 1, 1]} : vector<10x10x128xbf16> to vector<8x8x128xbf16>
    %36 = vector.shape_cast %35 : vector<8x8x128xbf16> to vector<64x128xbf16>
    %37 = tpu.concatenate %20, %22, %24, %26, %28, %30, %32, %34, %36 in 1 : vector<64x128xbf16>, vector<64x128xbf16>, vector<64x128xbf16>, vector<64x128xbf16>, vector<64x128xbf16>, vector<64x128xbf16>, vector<64x128xbf16>, vector<64x128xbf16>, vector<64x128xbf16> -> vector<64x1152xbf16>
    %cst_11 = arith.constant dense<0.000000e+00> : vector<64x128xf32>
    %38 = tpu.matmul %37, %14, %cst_11 {dimension_numbers = #tpu.dot_dimension_numbers<[1], [0], [0], [1], [0, 0, 1, 1], [], []>} : vector<64x1152xbf16>, vector<1152x128xbf16>, vector<64x128xf32> -> vector<64x128xf32>
    %39 = vector.shape_cast %38 : vector<64x128xf32> to vector<8x8x128xf32>
    %40 = arith.truncf %39 : vector<8x8x128xf32> to vector<8x8x128xbf16>
    %c0_12 = arith.constant 0 : index
    %c0_13 = arith.constant 0 : index
    %c0_14 = arith.constant 0 : index
    %c0_15 = arith.constant 0 : index
    %41 = vector.load %arg6[%c0_12, %c0_13, %c0_14, %c0_15] : memref<1x8x8x128xbf16, #tpu.memory_space<vmem>>, vector<1x8x8x128xbf16>
    %42 = vector.shape_cast %41 : vector<1x8x8x128xbf16> to vector<8x8x128xbf16>
    %43 = vector.shape_cast %40 : vector<8x8x128xbf16> to vector<1x8x8x128xbf16>
    tpu.vector_store %arg6[%c0_12, %c0_13, %c0_14, %c0_15], %43 {strides = array<i32>} : memref<1x8x8x128xbf16, #tpu.memory_space<vmem>>, vector<1x8x8x128xbf16>,
    %cst_16 = arith.constant dense<0.000000e+00> : vector<128xf32>
    %44 = vector.multi_reduction <add>, %38, %cst_16 [0] : vector<64x128xf32> to vector<128xf32>
    %45 = vector.shape_cast %44 : vector<128xf32> to vector<1x128xf32>
    %46 = arith.mulf %38, %38 : vector<64x128xf32>
    %cst_17 = arith.constant dense<0.000000e+00> : vector<128xf32>
    %47 = vector.multi_reduction <add>, %46, %cst_17 [0] : vector<64x128xf32> to vector<128xf32>
    %48 = vector.shape_cast %47 : vector<128xf32> to vector<1x128xf32>
    %49 = tpu.concatenate %45, %48 in 0 : vector<1x128xf32>, vector<1x128xf32> -> vector<2x128xf32>
    %c0_18 = arith.constant 0 : index
    %c0_19 = arith.constant 0 : index
    %c0_20 = arith.constant 0 : index
    %50 = vector.load %arg7[%c0_18, %c0_19, %c0_20] : memref<1x2x128xf32, #tpu.memory_space<vmem>>, vector<1x2x128xf32>
    %51 = vector.shape_cast %50 : vector<1x2x128xf32> to vector<2x128xf32>
    %52 = vector.shape_cast %49 : vector<2x128xf32> to vector<1x2x128xf32>
    tpu.vector_store %arg7[%c0_18, %c0_19, %c0_20], %52 {strides = array<i32>} : memref<1x2x128xf32, #tpu.memory_space<vmem>>, vector<1x2x128xf32>,
    return
  }
  func.func @transform_0(%arg0: i32, %arg1: i32) -> (i32, i32, i32, i32) {
    %c0_i32 = arith.constant 0 : i32
    %c0_i32_0 = arith.constant 0 : i32
    %c0_i32_1 = arith.constant 0 : i32
    %c0_i32_2 = arith.constant 0 : i32
    return %arg1, %c0_i32, %c0_i32_0, %c0_i32_1 : i32, i32, i32, i32
  }
  func.func @transform_1(%arg0: i32, %arg1: i32) -> (i32, i32) {
    %c0_i32 = arith.constant 0 : i32
    %c0_i32_0 = arith.constant 0 : i32
    %c0_i32_1 = arith.constant 0 : i32
    return %c0_i32, %c0_i32_0 : i32, i32
  }
  func.func @transform_2(%arg0: i32, %arg1: i32) -> (i32, i32) {
    %c0_i32 = arith.constant 0 : i32
    %c0_i32_0 = arith.constant 0 : i32
    %c0_i32_1 = arith.constant 0 : i32
    return %c0_i32, %c0_i32_0 : i32, i32
  }
  func.func @transform_3(%arg0: i32, %arg1: i32) -> (i32, i32) {
    %c0_i32 = arith.constant 0 : i32
    %c0_i32_0 = arith.constant 0 : i32
    return %c0_i32, %arg0 : i32, i32
  }
  func.func @transform_4(%arg0: i32, %arg1: i32) -> (i32, i32, i32, i32) {
    %c0_i32 = arith.constant 0 : i32
    %c0_i32_0 = arith.constant 0 : i32
    %c0_i32_1 = arith.constant 0 : i32
    return %arg1, %c0_i32, %c0_i32_0, %arg0 : i32, i32, i32, i32
  }
  func.func @transform_5(%arg0: i32, %arg1: i32) -> (i32, i32, i32) {
    %c0_i32 = arith.constant 0 : i32
    %c0_i32_0 = arith.constant 0 : i32
    return %arg1, %c0_i32, %arg0 : i32, i32, i32
  }
}

module attributes {stable_mosaic.version = 11 : i64} {
  func.func @_bn_add_relu_kernel(%arg0: i32, %arg1: i32, %arg2: memref<1x8x8x128xbf16, #tpu.memory_space<vmem>>, %arg3: memref<1x128xf32, #tpu.memory_space<vmem>>, %arg4: memref<1x128xf32, #tpu.memory_space<vmem>>, %arg5: memref<1x8x8x128xbf16, #tpu.memory_space<vmem>>, %arg6: memref<1x8x8x128xf32, #tpu.memory_space<vmem>>) attributes {dimension_semantics = [#tpu.dimension_semantics<parallel>, #tpu.dimension_semantics<parallel>], iteration_bounds = array<i64: 2, 1>, scalar_prefetch = 0 : i64, scratch_operands = 0 : i64, tpu.core_type = #tpu.core_type<tc>, window_params = [{transform_indices = @transform_0, window_bounds = array<i64: 1, 8, 8, 128>}, {transform_indices = @transform_1, window_bounds = array<i64: 1, 128>}, {transform_indices = @transform_2, window_bounds = array<i64: 1, 128>}, {transform_indices = @transform_3, window_bounds = array<i64: 1, 8, 8, 128>}, {transform_indices = @transform_4, window_bounds = array<i64: 1, 8, 8, 128>}]} {
    %c0 = arith.constant 0 : index
    %c0_0 = arith.constant 0 : index
    %c0_1 = arith.constant 0 : index
    %c0_2 = arith.constant 0 : index
    %0 = vector.load %arg5[%c0, %c0_0, %c0_1, %c0_2] : memref<1x8x8x128xbf16, #tpu.memory_space<vmem>>, vector<1x8x8x128xbf16>
    %1 = vector.shape_cast %0 : vector<1x8x8x128xbf16> to vector<8x8x128xbf16>
    %2 = arith.extf %1 : vector<8x8x128xbf16> to vector<8x8x128xf32>
    %c0_3 = arith.constant 0 : index
    %c0_4 = arith.constant 0 : index
    %c0_5 = arith.constant 0 : index
    %c0_6 = arith.constant 0 : index
    %3 = vector.load %arg2[%c0_3, %c0_4, %c0_5, %c0_6] : memref<1x8x8x128xbf16, #tpu.memory_space<vmem>>, vector<1x8x8x128xbf16>
    %4 = vector.shape_cast %3 : vector<1x8x8x128xbf16> to vector<8x8x128xbf16>
    %5 = arith.extf %4 : vector<8x8x128xbf16> to vector<8x8x128xf32>
    %c0_7 = arith.constant 0 : index
    %c0_8 = arith.constant 0 : index
    %6 = vector.load %arg3[%c0_7, %c0_8] : memref<1x128xf32, #tpu.memory_space<vmem>>, vector<1x128xf32>
    %7 = vector.shape_cast %6 : vector<1x128xf32> to vector<1x1x128xf32>
    %8 = vector.broadcast %7 : vector<1x1x128xf32> to vector<8x8x128xf32>
    %9 = arith.mulf %5, %8 : vector<8x8x128xf32>
    %10 = arith.addf %2, %9 : vector<8x8x128xf32>
    %c0_9 = arith.constant 0 : index
    %c0_10 = arith.constant 0 : index
    %11 = vector.load %arg4[%c0_9, %c0_10] : memref<1x128xf32, #tpu.memory_space<vmem>>, vector<1x128xf32>
    %12 = vector.shape_cast %11 : vector<1x128xf32> to vector<1x1x128xf32>
    %13 = vector.broadcast %12 : vector<1x1x128xf32> to vector<8x8x128xf32>
    %14 = arith.addf %10, %13 : vector<8x8x128xf32>
    %cst = arith.constant 0.000000e+00 : f32
    %15 = vector.broadcast %cst : f32 to vector<8x8x128xf32>
    %16 = arith.maximumf %14, %15 : vector<8x8x128xf32>
    %c0_11 = arith.constant 0 : index
    %c0_12 = arith.constant 0 : index
    %c0_13 = arith.constant 0 : index
    %c0_14 = arith.constant 0 : index
    %17 = vector.load %arg6[%c0_11, %c0_12, %c0_13, %c0_14] : memref<1x8x8x128xf32, #tpu.memory_space<vmem>>, vector<1x8x8x128xf32>
    %18 = vector.shape_cast %17 : vector<1x8x8x128xf32> to vector<8x8x128xf32>
    %19 = vector.shape_cast %16 : vector<8x8x128xf32> to vector<1x8x8x128xf32>
    tpu.vector_store %arg6[%c0_11, %c0_12, %c0_13, %c0_14], %19 {strides = array<i32>} : memref<1x8x8x128xf32, #tpu.memory_space<vmem>>, vector<1x8x8x128xf32>,
    return
  }
  func.func @transform_0(%arg0: i32, %arg1: i32) -> (i32, i32, i32, i32) {
    %c0_i32 = arith.constant 0 : i32
    %c0_i32_0 = arith.constant 0 : i32
    %c0_i32_1 = arith.constant 0 : i32
    return %arg0, %c0_i32, %c0_i32_0, %arg1 : i32, i32, i32, i32
  }
  func.func @transform_1(%arg0: i32, %arg1: i32) -> (i32, i32) {
    %c0_i32 = arith.constant 0 : i32
    %c0_i32_0 = arith.constant 0 : i32
    return %c0_i32, %arg1 : i32, i32
  }
  func.func @transform_2(%arg0: i32, %arg1: i32) -> (i32, i32) {
    %c0_i32 = arith.constant 0 : i32
    %c0_i32_0 = arith.constant 0 : i32
    return %c0_i32, %arg1 : i32, i32
  }
  func.func @transform_3(%arg0: i32, %arg1: i32) -> (i32, i32, i32, i32) {
    %c0_i32 = arith.constant 0 : i32
    %c0_i32_0 = arith.constant 0 : i32
    %c0_i32_1 = arith.constant 0 : i32
    return %arg0, %c0_i32, %c0_i32_0, %arg1 : i32, i32, i32, i32
  }
  func.func @transform_4(%arg0: i32, %arg1: i32) -> (i32, i32, i32, i32) {
    %c0_i32 = arith.constant 0 : i32
    %c0_i32_0 = arith.constant 0 : i32
    %c0_i32_1 = arith.constant 0 : i32
    return %arg0, %c0_i32, %c0_i32_0, %arg1 : i32, i32, i32, i32
  }
}

</mosaic_0001>

<bundles_post_ra>
// kernel: res_block_forward.4
= control target key start
LH: loop header
LB: loop body
LE: loop exit
PB: predicated region body
PF: predicated region fallthrough
CT: control target
= control target key end

     0   :  { %vm113_vm0 = vcmask 1043456   ;;  %vm88_vm1 = vcmask 326656   ;;  %s528_s1 = inlined_call_operand.vmem [shape: bf16[40,128], index: 1, kind: input, shape index: {}]   ;;  %s529_s0 = inlined_call_operand.vmem [shape: bf16[128,40], index: 0, kind: input, shape index: {}]   ;;  %s530_s2 = inlined_call_operand.vmem [shape: bf16[128,128], index: 2, kind: output, shape index: {}]  }
   0x1   :  { %v437_v0 = vld [vmem:[%s528_s1 + $0x10] ss:$0 sps:$4 sm:$0xff]   ;;  %v438_v1 = vld [vmem:[%s528_s1 + $0x8] sm:$0xff]   ;;  %v439_v3 = vld [vmem:[%s528_s1] sm:$0xff]  }
   0x2   :  { %435 = vmatprep.subr.msk.bf16.mxu0 %vm113_vm0, %v437_v0  ;;  %436 = vmatprep.subr.msk.bf16.mxu1 %vm113_vm0, %v437_v0  ;;  %v115_v2 = vsel %vm113_vm0, %v437_v0, 0  ;;  %v440_v4 = vld [vmem:[%s529_s0] sm:$0xff]   ;;  %v442_v6 = vld [vmem:[%s529_s0 + $0x8] sm:$0xff]   ;;  %v444_v8 = vld [vmem:[%s529_s0 + $0x10] sm:$0xff]  }
   0x3   :  { %408 = vmatpush3.bf16.msra.mxu0 %v115_v2  ;;  %432 = vmatpush3.bf16.msra.mxu1 %v115_v2  ;;  %v441_v5 = vld [vmem:[%s529_s0 + $0x20] sm:$0xff]   ;;  %v443_v7 = vld [vmem:[%s529_s0 + $0x28] sm:$0xff]   ;;  %v445_v9 = vld [vmem:[%s529_s0 + $0x30] sm:$0xff]  }
   0x4   :  { %409 = vmatprep.subr.bf16.mxu0 %v438_v1  ;;  %430 = vmatprep.subr.bf16.mxu1 %v438_v1  ;;  %v446_v10 = vld [vmem:[%s529_s0 + $0x18] sm:$0xff]  }
   0x5   :  { %413 = vmatprep.mubr.msk.bf16.mxu0 %vm88_vm1, %v440_v4  ;;  %421 = vmatprep.mubr.msk.bf16.mxu1 %vm88_vm1, %v441_v5  ;;  %v447_v11 = vld [vmem:[%s529_s0 + $0x38] sm:$0xff]  }
   0x7   :  { %410 = vmatpush3.bf16.msra.mxu0 %v438_v1  ;;  %433 = vmatpush3.bf16.msra.mxu1 %v438_v1 }
   0x8   :  { %411 = vmatprep.subr.bf16.mxu0 %v439_v3  ;;  %431 = vmatprep.subr.bf16.mxu1 %v439_v3 }
   0xb   :  { %412 = vmatpush3.bf16.msra.mxu0 %v439_v3  ;;  %434 = vmatpush3.bf16.msra.mxu1 %v439_v3 }
   0xe   :  { %414 = vmatmul.mubr.msk.bf16.vlgmr.msra.gmra.mxu0 %vm88_vm1, %v442_v6  ;;  %422 = vmatmul.mubr.msk.bf16.vlgmr.msra.gmra.mxu1 %vm88_vm1, %v443_v7 }
   0xf   :  { %417 = vmatprep.mubr.msk.bf16.mxu0 %vm88_vm1, %v444_v8  ;;  %425 = vmatprep.mubr.msk.bf16.mxu1 %vm88_vm1, %v445_v9 }
  0x16   :  { %418 = vmatmul.mubr.msk.bf16.gmra.mxu0 %vm88_vm1, %v446_v10  ;;  %426 = vmatmul.mubr.msk.bf16.gmra.mxu1 %vm88_vm1, %v447_v11 }
  0xce   :  { %v415_v12 = vpop.f32.mrf.mxu0  ;;  %v423_v13 = vpop.f32.mrf.mxu1 }
  0xd0   :  { %v151_v14 = vpop.f32.mrf.mxu0  ;;  %v183_v15 = vpop.f32.mrf.mxu1 }
  0xd2   :  { %v416_v16 = vpop.f32.mrf.mxu0  ;;  %v424_v17 = vpop.f32.mrf.mxu1 }
  0xd3   :  { %v357_v18 = vpack.c.bf16 %v416_v16, %v415_v12  ;;  %v377_v19 = vpack.c.bf16 %v424_v17, %v423_v13 }
  0xd4   :  { %v154_v20 = vpop.f32.mrf.mxu0  ;;  %v186_v21 = vpop.f32.mrf.mxu1 }
  0xd5   :  { %389 = vst [vmem:[%s530_s2 + $0x8] sm:$0xff] %v357_v18   ;;  %393 = vst [vmem:[%s530_s2 + $0x28] sm:$0xff] %v377_v19   ;;  %v352_v22 = vpack.c.bf16 %v154_v20, %v151_v14  ;;  %v372_v23 = vpack.c.bf16 %v186_v21, %v183_v15 }
  0xd6   :  { %v419_v24 = vpop.f32.mrf.mxu0  ;;  %v427_v25 = vpop.f32.mrf.mxu1 }
  0xd7   :  { %353 = vst [vmem:[%s530_s2] sm:$0xff] %v352_v22   ;;  %392 = vst [vmem:[%s530_s2 + $0x20] sm:$0xff] %v372_v23  }
  0xd8   :  { %v167_v26 = vpop.f32.mrf.mxu0  ;;  %v199_v27 = vpop.f32.mrf.mxu1 }
  0xda   :  { %v420_v28 = vpop.f32.mrf.mxu0  ;;  %v428_v29 = vpop.f32.mrf.mxu1 }
  0xdb   :  { %v367_v30 = vpack.c.bf16 %v420_v28, %v419_v24  ;;  %v387_v31 = vpack.c.bf16 %v428_v29, %v427_v25 }
  0xdc   :  { %v170_v32 = vpop.f32.mrf.mxu0  ;;  %v202_v33 = vpop.f32.mrf.mxu1 }
  0xdd   :  { %391 = vst [vmem:[%s530_s2 + $0x18] sm:$0xff] %v367_v30   ;;  %395 = vst [vmem:[%s530_s2 + $0x38] sm:$0xff] %v387_v31   ;;  %v362_v34 = vpack.c.bf16 %v170_v32, %v167_v26  ;;  %v382_v35 = vpack.c.bf16 %v202_v33, %v199_v27 }
  0xdf   :  { %390 = vst [vmem:[%s530_s2 + $0x10] sm:$0xff] %v362_v34   ;;  %394 = vst [vmem:[%s530_s2 + $0x30] sm:$0xff] %v382_v35  }

// kernel: res_block_forward.7
= control target key start
LH: loop header
LB: loop body
LE: loop exit
PB: predicated region body
PF: predicated region fallthrough
CT: control target
= control target key end

     0   :  { %s631_s15 = smov 0   ;;  %s633_s16 = smov 0   ;;  %s677_s0 = inlined_call_operand.vmem [shape: bf16[2,8,8,128], index: 0, kind: input, shape index: {}]   ;;  %s678_s1 = inlined_call_operand.vmem [shape: f32[1,128], index: 1, kind: input, shape index: {}]   ;;  %s679_s2 = inlined_call_operand.vmem [shape: f32[1,128], index: 2, kind: input, shape index: {}]   ;;  %s680_s3 = inlined_call_operand.vmem [shape: bf16[2,8,8,128], index: 3, kind: input, shape index: {}]   ;;  %s681_s4 = inlined_call_operand.vmem [shape: f32[2,8,8,128], index: 4, kind: output, shape index: {}]  }
   0x1   :  { %s635_s17 = smov 0  }
   0x2 LB: > { %s26_s18 = sadd.s32 1, %s600_s16  ;;  %p506_p0 = scmp.ge.s32.totalorder %s604_s17, 1  ;;  %s604_s17 = sphi %s635_s17, %s14_s17   ;;  %s600_s16 = sphi %s633_s16, %s683_s16   ;;  %s596_s15 = sphi %s631_s15, %s682_s15  }
   0x3   : > { %p28_p1 = scmp.ge.s32.totalorder %s26_s18, 2  ;;  %p212_p2 = scmp.lt.s32.totalorder %s604_s17, 3 }
   0x5   : > { %s685_s18 = smov (%p28_p1, %s26_s18), 0  ;;  %p213_p3 = pnand %p506_p0, %p212_p2 }
   0x6   : > { %p258_p4 = scmp.lt.s32.totalorder (!%p213_p3), %s596_s15, 1 }
   0x7   : > { %216 = sbr.rel (%p213_p3) target bundleno = 35 (0x23), region = 36 }
   0xc   : > { %s687_s15 = smov (!%p258_p4, %s596_s15), 1  ;;  %v513_v0 = vld [vmem:[%s678_s1] ss:$0 sm:$0xff] }
   0xd   : > { %s517_s19 = sshll.u32 %s687_s15, 5  ;;  %v514_v21 = vld [vmem:[%s679_s2] ss:$0 sm:$0xff]  ;;  %s519_s30 = sshll.u32 %s687_s15, 6 }
   0xe   : > { %s265_s22 = scalar_lea.vmem %s677_s0, %s517_s19  ;;  %s279_s25 = scalar_lea.vmem %s680_s3, %s517_s19 }
   0xf   : > { %v521_v1 = vld [vmem:[%s279_s25] sm:$0xff]   ;;  %v552_v3 = vld [vmem:[%s279_s25 + $0x8] sm:$0xff]   ;;  %v553_v9 = vld [vmem:[%s279_s25 + $0x10] sm:$0xff]   ;;  %s287_s7 = scalar_lea.vmem %s681_s4, %s519_s30 }
  0x10   : > { %v537_v2 = vld [vmem:[%s265_s22] sm:$0xff]   ;;  %v522_v4 = vunpack.c.l.bf16 %v521_v1  ;;  %v523_v6 = vunpack.c.h.bf16 %v521_v1  ;;  %v555_v8 = vld [vmem:[%s265_s22 + $0x8] sm:$0xff]   ;;  %v556_v10 = vld [vmem:[%s265_s22 + $0x10] sm:$0xff]   ;;  %v526_v11 = vunpack.c.l.bf16 %v552_v3  ;;  %v527_v13 = vunpack.c.h.bf16 %v552_v3 }
  0x11   : > { %v538_v5 = vunpack.c.l.bf16 %v537_v2  ;;  %v539_v7 = vunpack.c.h.bf16 %v537_v2  ;;  %v542_v12 = vunpack.c.l.bf16 %v555_v8  ;;  %v543_v14 = vunpack.c.h.bf16 %v555_v8  ;;  %v554_v15 = vld [vmem:[%s279_s25 + $0x18] sm:$0xff]  }
  0x12   : > { %v530_v18 = vunpack.c.l.bf16 %v553_v9  ;;  %v546_v19 = vunpack.c.l.bf16 %v556_v10  ;;  %v557_v20 = vld [vmem:[%s265_s22 + $0x18] sm:$0xff]   ;;  %v531_v24 = vunpack.c.h.bf16 %v553_v9  ;;  %v547_v25 = vunpack.c.h.bf16 %v556_v10 }
  0x13   : > { %v327_v16 = vmul.f32 %v538_v5, %v513_v0  ;;  %v328_v17 = vmul.f32 %v539_v7, %v513_v0  ;;  %v329_v22 = vmul.f32 %v542_v12, %v513_v0  ;;  %v330_v23 = vmul.f32 %v543_v14, %v513_v0 }
  0x14   : > { %v331_v28 = vmul.f32 %v546_v19, %v513_v0  ;;  %v534_v29 = vunpack.c.l.bf16 %v554_v15  ;;  %v332_v32 = vmul.f32 %v547_v25, %v513_v0  ;;  %v550_v33 = vunpack.c.l.bf16 %v557_v20 }
  0x15   : > { %v335_v26 = vadd.f32 %v522_v4, %v327_v16  ;;  %v336_v27 = vadd.f32 %v523_v6, %v328_v17  ;;  %v337_v30 = vadd.f32 %v526_v11, %v329_v22  ;;  %v338_v31 = vadd.f32 %v527_v13, %v330_v23 }
  0x16   : > { %v339_v36 = vadd.f32 %v530_v18, %v331_v28  ;;  %v535_v37 = vunpack.c.h.bf16 %v554_v15  ;;  %v340_v40 = vadd.f32 %v531_v24, %v332_v32  ;;  %v333_v41 = vmul.f32 %v550_v33, %v513_v0 }
  0x17   : > { %v350_v34 = vadd.f32 %v514_v21, %v335_v26  ;;  %v351_v35 = vadd.f32 %v514_v21, %v336_v27  ;;  %v352_v38 = vadd.f32 %v514_v21, %v337_v30  ;;  %v353_v39 = vadd.f32 %v514_v21, %v338_v31 }
  0x18   : > { %v354_v44 = vadd.f32 %v514_v21, %v339_v36  ;;  %v551_v45 = vunpack.c.h.bf16 %v557_v20  ;;  %v355_v48 = vadd.f32 %v514_v21, %v340_v40  ;;  %v341_v49 = vadd.f32 %v534_v29, %v333_v41 }
  0x19   : > { %v358_v42 = vmax.f32 %v350_v34, 0.0  ;;  %v359_v43 = vmax.f32 %v351_v35, 0.0  ;;  %v360_v46 = vmax.f32 %v352_v38, 0.0  ;;  %v361_v47 = vmax.f32 %v353_v39, 0.0 }
  0x1a   : > { %v362_v50 = vmax.f32 %v354_v44, 0.0  ;;  %v334_v51 = vmul.f32 %v551_v45, %v513_v0  ;;  %v363_v52 = vmax.f32 %v355_v48, 0.0  ;;  %v356_v53 = vadd.f32 %v514_v21, %v341_v49 }
  0x1b   : > { %366 = vst [vmem:[%s287_s7] sm:$0xff] %v358_v42  ;;  %367 = vst [vmem:[%s287_s7 + $0x8] sm:$0xff] %v359_v43 }
  0x1c   : > { %368 = vst [vmem:[%s287_s7 + $0x10] sm:$0xff] %v360_v46  ;;  %369 = vst [vmem:[%s287_s7 + $0x18] sm:$0xff] %v361_v47  ;;  %v342_v54 = vadd.f32 %v535_v37, %v334_v51  ;;  %v364_v55 = vmax.f32 %v356_v53, 0.0 }
  0x1d   : > { %370 = vst [vmem:[%s287_s7 + $0x20] sm:$0xff] %v362_v50  ;;  %371 = vst [vmem:[%s287_s7 + $0x28] sm:$0xff] %v363_v52 }
  0x1e   : > { %v357_v56 = vadd.f32 %v514_v21, %v342_v54  ;;  %372 = vst [vmem:[%s287_s7 + $0x30] sm:$0xff] %v364_v55 }
  0x20   : > { %v365_v57 = vmax.f32 %v357_v56, 0.0 }
  0x22   : > { %373 = vst [vmem:[%s287_s7 + $0x38] sm:$0xff] %v365_v57 }
  0x23 PF: > { %s14_s17 = sadd.s32 1, %s604_s17   ;;  %s682_s15 = smov %s600_s16 }
  0x24   : > { %p11_p5 = scmp.ge.s32.totalorder %s14_s17, 4   ;;  %s683_s16 = smov %s685_s18 }
  0x26   :  { %13 = sbr.rel (!%p11_p5) target bundleno = 2 (0x2), region = 75 }

// kernel: res_block_forward.5
= control target key start
LH: loop header
LB: loop body
LE: loop exit
PB: predicated region body
PF: predicated region fallthrough
CT: control target
= control target key end

     0   :  { %s2223_s12 = smov 0   ;;  %s2225_s13 = smov 0   ;;  %s2795_s0 = inlined_call_operand.vmem [shape: bf16[2,8,8,128], index: 0, kind: input, shape index: {}]   ;;  %s2796_s1 = inlined_call_operand.vmem [shape: bf16[1152,128], index: 1, kind: input, shape index: {}]   ;;  %s2797_s2 = inlined_call_operand.vmem [shape: bf16[2,8,8,128], index: 2, kind: output, shape index: {0}]   ;;  %s2798_s3 = inlined_call_operand.vmem [shape: f32[2,2,128], index: 3, kind: output, shape index: {1}]  }
   0x1   :  { %s2227_s14 = smov 0  }
   0x2 LB: > { %s23_s15 = sadd.s32 1, %s2196_s13  ;;  %p1710_p0 = scmp.ge.s32.totalorder %s2200_s14, 1  ;;  %s2200_s14 = sphi %s2227_s14, %s14_s14   ;;  %s2196_s13 = sphi %s2225_s13, %s2822_s13   ;;  %s2192_s12 = sphi %s2223_s12, %s2821_s12  }
   0x3   : > { %p24_p1 = scmp.ge.s32.totalorder %s23_s15, 2  ;;  %p165_p2 = scmp.lt.s32.totalorder %s2200_s14, 3 }
   0x5   : > { %s2824_s15 = smov (%p24_p1, %s23_s15), 0  ;;  %p166_p3 = pnand %p1710_p0, %p165_p2 }
   0x7   : > { %169 = sbr.rel (%p166_p3) target bundleno = 353 (0x161), region = 28 }
   0xc   : > { %v2106_v0 = vld [vmem:[%s2796_s1 + $0x78] sm:$0xff]   ;;  %v2110_v4 = vld [vmem:[%s2796_s1 + $0x70] sm:$0xff]   ;;  %v2114_v8 = vld [vmem:[%s2796_s1 + $0x68] sm:$0xff]   ;;  %p203_p4 = scmp.lt.s32.totalorder %s2192_s12, 1  ;;  %v2202_v32 = vmov 0   ;;  %vm452_vm0 = vcmask 1040384  }
   0xd   : > { %v2107_v1 = vld [vmem:[%s2796_s1 + $0xf8] sm:$0xff]   ;;  %1869 = vmatprep.subr.bf16.mxu0 %v2106_v0  ;;  %v2111_v5 = vld [vmem:[%s2796_s1 + $0xf0] sm:$0xff]   ;;  %v2115_v9 = vld [vmem:[%s2796_s1 + $0xe8] sm:$0xff]   ;;  %v383_v33 = vrot.slane %v2202_v32, 7  ;;  %vm464_vm1 = vcmask 1044480   ;;  %vm631_vm8 = vcmask 1042432  }
   0xe   : > { %v2108_v2 = vld [vmem:[%s2796_s1 + $0x38] sm:$0xff]   ;;  %1909 = vmatprep.subr.bf16.mxu1 %v2107_v1  ;;  %v2112_v6 = vld [vmem:[%s2796_s1 + $0x30] sm:$0xff]   ;;  %v2116_v10 = vld [vmem:[%s2796_s1 + $0x28] sm:$0xff]   ;;  %s2826_s12 = smov (!%p203_p4, %s2192_s12), 1  ;;  %vm453_vm2 = vsmask.f32 256 }
   0xf   : > { %v2109_v3 = vld [vmem:[%s2796_s1 + $0xb8] sm:$0xff]   ;;  %1870 = vmatpush3.bf16.msra.mxu0 %v2108_v2  ;;  %v2113_v7 = vld [vmem:[%s2796_s1 + $0xb0] sm:$0xff]   ;;  %v2117_v11 = vld [vmem:[%s2796_s1 + $0xa8] sm:$0xff]   ;;  %s1844_s24 = sshll.u32 %s2826_s12, 5  ;;  %vm465_vm3 = vsmask.f32 4352 }
  0x10   : > { %1910 = vmatpush3.bf16.msra.mxu1 %v2109_v3  ;;  %1871 = vmatprep.subr.bf16.mxu0 %v2110_v4  ;;  %v2118_v12 = vld [vmem:[%s2796_s1 + $0x60] sm:$0xff]   ;;  %v2122_v16 = vld [vmem:[%s2796_s1 + $0x58] sm:$0xff]   ;;  %v2126_v20 = vld [vmem:[%s2796_s1 + $0x50] sm:$0xff]   ;;  %s2343_s6 = scalar_lea.vmem %s2795_s0, %s1844_s24  ;;  %vm516_vm6 = vsmask.f32 3328  ;;  %vm632_vm9 = vcmask 1046532   ;;  %s219_s7 = scalar_lea.vmem %s2797_s2, %s1844_s24 }
  0x11   : > { %1911 = vmatprep.subr.bf16.mxu1 %v2111_v5  ;;  %v2119_v13 = vld [vmem:[%s2796_s1 + $0xe0] sm:$0xff]   ;;  %v2123_v17 = vld [vmem:[%s2796_s1 + $0xd8] sm:$0xff]   ;;  %v2127_v21 = vld [vmem:[%s2796_s1 + $0xd0] sm:$0xff]   ;;  %vm517_vm7 = vsmask.f32 7440  ;;  %s1715_s24 = sshll.u32 %s2826_s12, 1 }
  0x12   : > { %v2120_v14 = vld [vmem:[%s2796_s1 + $0x20] sm:$0xff]   ;;  %v2124_v18 = vld [vmem:[%s2796_s1 + $0x18] sm:$0xff]   ;;  %v2128_v22 = vld [vmem:[%s2796_s1 + $0x10] sm:$0xff]   ;;  %s226_s10 = scalar_lea.vmem %s2798_s3, %s1715_s24 }
  0x13   : > { %1872 = vmatpush3.bf16.msra.mxu0 %v2112_v6  ;;  %v2121_v15 = vld [vmem:[%s2796_s1 + $0xa0] sm:$0xff]   ;;  %v2125_v19 = vld [vmem:[%s2796_s1 + $0x98] sm:$0xff]   ;;  %v2129_v23 = vld [vmem:[%s2796_s1 + $0x90] sm:$0xff]  }
  0x14   : > { %1912 = vmatpush3.bf16.msra.mxu1 %v2113_v7  ;;  %1873 = vmatprep.subr.bf16.mxu0 %v2114_v8  ;;  %v2130_v24 = vld [vmem:[%s2796_s1 + $0x48] sm:$0xff]   ;;  %v2134_v28 = vld [vmem:[%s2796_s1 + $0x40] sm:$0xff]   ;;  %v235_v40 = vld [vmem:[%s2343_s6 + $0x1c] sm:$0xf] }
  0x15   : > { %1913 = vmatprep.subr.bf16.mxu1 %v2115_v9  ;;  %v2131_v25 = vld [vmem:[%s2796_s1 + $0xc8] sm:$0xff]   ;;  %v2135_v29 = vld [vmem:[%s2796_s1 + $0xc0] sm:$0xff]   ;;  %vm2355_vm4 = vmand %vm452_vm0, %vm453_vm2  ;;  %v437_v53 = vshrl.u32 %v235_v40, 16  ;;  %v440_v62 = vshll.u32 %v235_v40, 16 }
  0x16   : > { %v2132_v26 = vld [vmem:[%s2796_s1 + $0x8] sm:$0xff]   ;;  %v2136_v30 = vld [vmem:[%s2796_s1] sm:$0xff]   ;;  %v455_v44 = vsel %vm2355_vm4, 0, %v383_v33  ;;  %vm2361_vm5 = vmand %vm464_vm1, %vm465_vm3 }
  0x17   : > { %1874 = vmatpush3.bf16.msra.mxu0 %v2116_v10  ;;  %v2133_v27 = vld [vmem:[%s2796_s1 + $0x88] sm:$0xff]   ;;  %v2137_v31 = vld [vmem:[%s2796_s1 + $0x80] sm:$0xff]   ;;  %v2138_v46 = vld [vmem:[%s2796_s1 + $0x178] sm:$0xff]   ;;  %v2370_v49 = vsel %vm2361_vm5, %v455_v44, 0  ;;  %v439_v2 = vrot.slane %v437_v53, 7 }
  0x18   : > { %1914 = vmatpush3.bf16.msra.mxu1 %v2117_v11  ;;  %1875 = vmatprep.subr.bf16.mxu0 %v2118_v12  ;;  %v228_v34 = vld [vmem:[%s2343_s6] sm:$0xf]  ;;  %v229_v35 = vld [vmem:[%s2343_s6 + $0x4] sm:$0xf]  ;;  %v1716_v50 = vcombine.low %v2370_v49, %v2370_v49  ;;  %v1717_v51 = vcombine.high %v2370_v49, %v2370_v49  ;;  %v2139_v52 = vld [vmem:[%s2796_s1 + $0x1f8] sm:$0xff]  }
  0x19   : > { %1915 = vmatprep.subr.bf16.mxu1 %v2119_v13  ;;  %v388_v36 = vshrl.u32 %v228_v34, 16  ;;  %v391_v37 = vshll.u32 %v228_v34, 16  ;;  %v395_v38 = vshrl.u32 %v229_v35, 16  ;;  %v398_v39 = vshll.u32 %v229_v35, 16  ;;  %vm2404_vm10 = vmor %vm516_vm6, %vm517_vm7  ;;  %v2168_v43 = vld [vmem:[%s2796_s1 + $0x100] sm:$0xff]  }
  0x1a   : > { %v520_v58 = vshrl.u32 %v1716_v50, 16  ;;  %v523_v0 = vshll.u32 %v1716_v50, 16  ;;  %v529_v1 = vshll.u32 %v1717_v51, 16  ;;  %v2401_v13 = vor.u32 %v440_v62, %v439_v2  ;;  %vm2412_vm11 = vmor %vm631_vm8, %vm632_vm9  ;;  %v2147_v62 = vld [vmem:[%s2796_s1 + $0x1e8] sm:$0xff]   ;;  %v2169_v45 = vld [vmem:[%s2796_s1 + $0x180] sm:$0xff]  }
  0x1b   : > { %1876 = vmatpush3.bf16.msra.mxu0 %v2120_v14  ;;  %v390_v41 = vrot.slane %v388_v36, 7  ;;  %v397_v42 = vrot.slane %v395_v38, 7  ;;  %v2142_v38 = vld [vmem:[%s2796_s1 + $0x170] sm:$0xff]  }
  0x1c   : > { %1916 = vmatpush3.bf16.msra.mxu1 %v2121_v15  ;;  %1877 = vmatprep.subr.bf16.mxu0 %v2122_v16  ;;  %v522_v63 = vrot.slane %v520_v58, 4  ;;  %v525_v6 = vrot.slane %v523_v0, 5  ;;  %v531_v12 = vrot.slane %v529_v1, 5  ;;  %v2145_v58 = vld [vmem:[%s2796_s1 + $0x1b0] sm:$0xff]   ;;  %v2148_v0 = vld [vmem:[%s2796_s1 + $0x128] sm:$0xff]  }
  0x1d   : > { %1917 = vmatprep.subr.bf16.mxu1 %v2123_v17  ;;  %v393_v47 = vor.u32 %v391_v37, %v390_v41  ;;  %v400_v48 = vor.u32 %v398_v39, %v397_v42  ;;  %v2141_v37 = vld [vmem:[%s2796_s1 + $0x1b8] sm:$0xff]   ;;  %v232_v1 = vld [vmem:[%s2343_s6 + $0x10] sm:$0xf] }
  0x1e   : > { %v526_v11 = vor.u32 %v525_v6, %v522_v63  ;;  %v416_v6 = vshrl.u32 %v232_v1, 16  ;;  %v2175_v14 = vld [vmem:[%s2796_s1 + $0x210] sm:$0xff]  }
  0x1f   : > { %1878 = vmatpush3.bf16.msra.mxu0 %v2124_v18  ;;  %v456_v54 = vsel %vm2355_vm4, 0, %v393_v47  ;;  %v457_v55 = vsel %vm2355_vm4, 0, %v400_v48  ;;  %v2143_v47 = vld [vmem:[%s2796_s1 + $0x1f0] sm:$0xff]  }
  0x20   : > { %1918 = vmatpush3.bf16.msra.mxu1 %v2125_v19  ;;  %1879 = vmatprep.subr.bf16.mxu0 %v2126_v20  ;;  %v2385_v56 = vsel %vm2361_vm5, %v456_v54, 0  ;;  %v2389_v57 = vsel %vm2361_vm5, %v457_v55, 0  ;;  %v527_v19 = vrot.slane %v526_v11, 4  ;;  %v2144_v48 = vld [vmem:[%s2796_s1 + $0x130] sm:$0xff]   ;;  %v419_v11 = vshll.u32 %v232_v1, 16  ;;  %v2157_v1 = vld [vmem:[%s2796_s1 + $0x198] sm:$0xff]  }
  0x21   : > { %1919 = vmatprep.subr.bf16.mxu1 %v2127_v21  ;;  %v1718_v59 = vcombine.low %v2385_v56, %v2385_v56  ;;  %v1719_v60 = vcombine.high %v2385_v56, %v2385_v56  ;;  %v2397_v61 = vcombine.low %v2389_v57, %v2389_v57  ;;  %v1755_v17 = vcombine.low %v2385_v56, %v2389_v57 }
  0x22   : > { %v1721_v18 = vcombine.high %v2389_v57, %v2389_v57  ;;  %v1743_v32 = vcombine.low %v2370_v49, %v2385_v56  ;;  %v2146_v56 = vld [vmem:[%s2796_s1 + $0x168] sm:$0xff]  }
  0x23   : > { %1880 = vmatpush3.bf16.msra.mxu0 %v2128_v22  ;;  %v534_v3 = vshrl.u32 %v1718_v59, 16  ;;  %v537_v4 = vshll.u32 %v1718_v59, 16  ;;  %v543_v5 = vshll.u32 %v1719_v60, 16  ;;  %v548_v7 = vshrl.u32 %v2397_v61, 16  ;;  %1290 = vmatprep.mubr.bf16.mxu1 %v1755_v17 }
  0x24   : > { %1920 = vmatpush3.bf16.msra.mxu1 %v2129_v23  ;;  %1881 = vmatprep.subr.bf16.mxu0 %v2130_v24  ;;  %v551_v10 = vshll.u32 %v2397_v61, 16  ;;  %v1732_v24 = vrot.slane %v1716_v50, 9  ;;  %v1733_v33 = vrot.slane %v1718_v59, 9  ;;  %v640_v36 = vrot.slane %v1719_v60, 5  ;;  %v2177_v23 = vld [vmem:[%s2796_s1 + $0x200] sm:$0xff]  }
  0x25   : > { %1921 = vmatprep.subr.bf16.mxu1 %v2131_v25  ;;  %v536_v8 = vrot.slane %v534_v3, 4  ;;  %v539_v9 = vrot.slane %v537_v4, 5  ;;  %v545_v16 = vrot.slane %v543_v5, 5  ;;  %v550_v20 = vrot.slane %v548_v7, 4  ;;  %v2150_v5 = vld [vmem:[%s2796_s1 + $0x160] sm:$0xff]  }
  0x26   : > { %v553_v22 = vrot.slane %v551_v10, 5  ;;  %v636_v25 = vrot.slane %v1717_v51, 5  ;;  %v557_v39 = vshll.u32 %v1721_v18, 16  ;;  %v1734_v51 = vrot.slane %v2397_v61, 9  ;;  %v233_v7 = vld [vmem:[%s2343_s6 + $0x14] sm:$0xf] }
  0x27   : > { %1882 = vmatpush3.bf16.msra.mxu0 %v2132_v26  ;;  %v540_v15 = vor.u32 %v539_v9, %v536_v8  ;;  %v2418_v26 = vsel %vm2404_vm10, %v527_v19, %v531_v12  ;;  %v644_v55 = vrot.slane %v1721_v18, 5  ;;  %v2149_v10 = vld [vmem:[%s2796_s1 + $0x1a8] sm:$0xff]   ;;  %v423_v12 = vshrl.u32 %v233_v7, 16  ;;  %v2151_v19 = vld [vmem:[%s2796_s1 + $0x1e0] sm:$0xff]  }
  0x28   : > { %1922 = vmatpush3.bf16.msra.mxu1 %v2133_v27  ;;  %1883 = vmatprep.subr.bf16.mxu0 %v2134_v28  ;;  %v2140_v27 = vld [vmem:[%s2796_s1 + $0x138] sm:$0xff]   ;;  %v230_v28 = vld [vmem:[%s2343_s6 + $0x8] sm:$0xf]  ;;  %v2438_v35 = vsel %vm2412_vm11, %v1732_v24, %v636_v25  ;;  %v554_v44 = vor.u32 %v553_v22, %v550_v20  ;;  %v2465_v59 = vrot.slane %v557_v39, 5  ;;  %v2152_v20 = vld [vmem:[%s2796_s1 + $0x120] sm:$0xff]   ;;  %v426_v25 = vshll.u32 %v233_v7, 16 }
  0x29   : > { %1923 = vmatprep.subr.bf16.mxu1 %v2135_v29  ;;  %v541_v21 = vrot.slane %v540_v15, 4  ;;  %v231_v29 = vld [vmem:[%s2343_s6 + $0xc] sm:$0xf]  ;;  %v402_v40 = vshrl.u32 %v230_v28, 16  ;;  %v405_v41 = vshll.u32 %v230_v28, 16  ;;  %v2482_v4 = vsel %vm2412_vm11, %v1734_v51, %v644_v55  ;;  %v2154_v39 = vld [vmem:[%s2796_s1 + $0x158] sm:$0xff]  }
  0x2a   : > { %v409_v42 = vshrl.u32 %v231_v29, 16  ;;  %v412_v50 = vshll.u32 %v231_v29, 16  ;;  %v2470_v63 = vrot.slane %v554_v44, 4  ;;  %v425_v24 = vrot.slane %v423_v12, 7 }
  0x2b   : > { %1884 = vmatpush3.bf16.msra.mxu0 %v2136_v30  ;;  %v463_v30 = vsel %vm2355_vm4, 0, %v2401_v13  ;;  %v404_v53 = vrot.slane %v402_v40, 7 }
  0x2c   : > { %1924 = vmatpush3.bf16.msra.mxu1 %v2137_v31  ;;  %1949 = vmatprep.subr.bf16.mxu0 %v2138_v46  ;;  %v2430_v31 = vsel %vm2404_vm10, %v541_v21, %v545_v16  ;;  %v2448_v46 = vsel %vm2412_vm11, %v1733_v33, %v640_v36  ;;  %v411_v54 = vrot.slane %v409_v42, 7  ;;  %v418_v21 = vrot.slane %v416_v6, 7 }
  0x2d   : > { %1989 = vmatprep.subr.bf16.mxu1 %v2139_v52  ;;  %v1747_v34 = vcombine.low %v2418_v26, %v2430_v31  ;;  %v1751_v52 = vcombine.low %v2438_v35, %v2448_v46  ;;  %v407_v60 = vor.u32 %v405_v41, %v404_v53  ;;  %v2156_v53 = vld [vmem:[%s2796_s1 + $0x118] sm:$0xff]  }
  0x2e   : > { %v414_v61 = vor.u32 %v412_v50, %v411_v54  ;;  %v421_v36 = vor.u32 %v419_v11, %v418_v21 }
  0x2f   : > { %1225 = vmatprep.mubr.bf16.mxu0 %v1747_v34  ;;  %1291 = vmatmul.mubr.bf16.vlgmr.msra.gmra.mxu1 %v1751_v52  ;;  %v458_v2 = vsel %vm2355_vm4, 0, %v407_v60  ;;  %v2153_v34 = vld [vmem:[%s2796_s1 + $0x1a0] sm:$0xff]  }
  0x30   : > { %1226 = vmatmul.mubr.bf16.vlgmr.msra.gmra.mxu0 %v1743_v32  ;;  %1990 = vmatpush3.bf16.msra.mxu1 %v2141_v37  ;;  %v459_v3 = vsel %vm2355_vm4, 0, %v414_v61  ;;  %v2490_v8 = vsel %vm2361_vm5, %v458_v2, 0  ;;  %v460_v50 = vsel %vm2355_vm4, 0, %v421_v36  ;;  %v2158_v2 = vld [vmem:[%s2796_s1 + $0x150] sm:$0xff]  }
  0x31   : > { %1950 = vmatpush3.bf16.msra.mxu0 %v2140_v27  ;;  %1991 = vmatprep.subr.bf16.mxu1 %v2143_v47  ;;  %v2494_v9 = vsel %vm2361_vm5, %v459_v3, 0  ;;  %v1722_v15 = vcombine.low %v2490_v8, %v2490_v8  ;;  %v1723_v16 = vcombine.high %v2490_v8, %v2490_v8  ;;  %v2155_v47 = vld [vmem:[%s2796_s1 + $0x1d8] sm:$0xff]   ;;  %v2559_v3 = vsel %vm2404_vm10, %v2470_v63, %v2465_v59  ;;  %v2161_v36 = vld [vmem:[%s2796_s1 + $0x190] sm:$0xff]  }
  0x32   : > { %1951 = vmatprep.subr.bf16.mxu0 %v2142_v38  ;;  %v2505_v17 = vcombine.low %v2494_v9, %v2494_v9  ;;  %v1756_v18 = vcombine.low %v2490_v8, %v2494_v9  ;;  %v1725_v22 = vcombine.high %v2494_v9, %v2494_v9  ;;  %v2572_v63 = vcombine.low %v2389_v57, %v2490_v8  ;;  %v2160_v57 = vld [vmem:[%s2796_s1 + $0x110] sm:$0xff]   ;;  %v234_v8 = vld [vmem:[%s2343_s6 + $0x18] sm:$0xf] }
  0x33   : > { %v562_v27 = vshrl.u32 %v1722_v15, 16  ;;  %v565_v28 = vshll.u32 %v1722_v15, 16  ;;  %v571_v29 = vshll.u32 %v1723_v16, 16  ;;  %v1735_v32 = vrot.slane %v1722_v15, 9 }
  0x34   : > { %1992 = vmatpush3.bf16.msra.mxu1 %v2145_v58  ;;  %1298 = vmatprep.mubr.bf16.mxu1 %v1756_v18  ;;  %v648_v33 = vrot.slane %v1723_v16, 5  ;;  %v576_v37 = vshrl.u32 %v2505_v17, 16  ;;  %v579_v38 = vshll.u32 %v2505_v17, 16  ;;  %v585_v44 = vshll.u32 %v1725_v22, 16 }
  0x35   : > { %1952 = vmatpush3.bf16.msra.mxu0 %v2144_v48  ;;  %1993 = vmatprep.subr.bf16.mxu1 %v2147_v62  ;;  %v564_v40 = vrot.slane %v562_v27, 4  ;;  %v567_v41 = vrot.slane %v565_v28, 5  ;;  %v573_v42 = vrot.slane %v571_v29, 5  ;;  %v1736_v6 = vrot.slane %v2505_v17, 9 }
  0x36   : > { %1953 = vmatprep.subr.bf16.mxu0 %v2146_v56  ;;  %v2530_v48 = vsel %vm2412_vm11, %v1735_v32, %v648_v33  ;;  %v578_v51 = vrot.slane %v576_v37, 4  ;;  %v581_v52 = vrot.slane %v579_v38, 5  ;;  %v2543_v56 = vsel %vm2361_vm5, %v460_v50, 0 }
  0x37   : > { %v568_v54 = vor.u32 %v567_v41, %v564_v40  ;;  %v2539_v55 = vcombine.low %v2482_v4, %v2530_v48  ;;  %v587_v58 = vrot.slane %v585_v44, 5  ;;  %v1726_v60 = vcombine.low %v2543_v56, %v2543_v56 }
  0x38   : > { %1994 = vmatpush3.bf16.msra.mxu1 %v2149_v10  ;;  %v1727_v61 = vcombine.high %v2543_v56, %v2543_v56  ;;  %v582_v62 = vor.u32 %v581_v52, %v578_v51  ;;  %v652_v7 = vrot.slane %v1725_v22, 5  ;;  %v2159_v10 = vld [vmem:[%s2796_s1 + $0x1d0] sm:$0xff]   ;;  %v430_v29 = vshrl.u32 %v234_v8, 16  ;;  %v2164_v52 = vld [vmem:[%s2796_s1 + $0x108] sm:$0xff]  }
  0x39   : > { %1954 = vmatpush3.bf16.msra.mxu0 %v2148_v0  ;;  %1995 = vmatprep.subr.bf16.mxu1 %v2151_v19  ;;  %v428_v0 = vor.u32 %v426_v25, %v425_v24  ;;  %v590_v12 = vshrl.u32 %v1726_v60, 16  ;;  %v593_v15 = vshll.u32 %v1726_v60, 16  ;;  %v1737_v18 = vrot.slane %v1726_v60, 9  ;;  %v2162_v24 = vld [vmem:[%s2796_s1 + $0x148] sm:$0xff]  }
  0x3a   : > { %1955 = vmatprep.subr.bf16.mxu0 %v2150_v5  ;;  %v569_v5 = vrot.slane %v568_v54, 4  ;;  %1299 = vmatmul.mubr.bf16.gmra.mxu1 %v2539_v55  ;;  %v583_v11 = vrot.slane %v582_v62, 4  ;;  %v599_v16 = vshll.u32 %v1727_v61, 16  ;;  %v2582_v22 = vsel %vm2412_vm11, %v1736_v6, %v652_v7 }
  0x3b   : > { %v461_v17 = vsel %vm2355_vm4, 0, %v428_v0  ;;  %v595_v21 = vrot.slane %v593_v15, 5  ;;  %v656_v28 = vrot.slane %v1727_v61, 5  ;;  %v433_v37 = vshll.u32 %v234_v8, 16  ;;  %v2166_v61 = vld [vmem:[%s2796_s1 + $0x140] sm:$0xff]  }
  0x3c   : > { %1996 = vmatpush3.bf16.msra.mxu1 %v2153_v34  ;;  %v2568_v59 = vsel %vm2404_vm10, %v569_v5, %v573_v42  ;;  %v601_v25 = vrot.slane %v599_v16, 5  ;;  %v2593_v27 = vsel %vm2361_vm5, %v461_v17, 0  ;;  %v2606_v38 = vsel %vm2404_vm10, %v583_v11, %v587_v58  ;;  %v2163_v42 = vld [vmem:[%s2796_s1 + $0x1c8] sm:$0xff]  }
  0x3d   : > { %1956 = vmatpush3.bf16.msra.mxu0 %v2152_v20  ;;  %1997 = vmatprep.subr.bf16.mxu1 %v2155_v47  ;;  %v2578_v19 = vcombine.low %v2559_v3, %v2568_v59  ;;  %v592_v20 = vrot.slane %v590_v12, 4  ;;  %v1728_v33 = vcombine.low %v2593_v27, %v2593_v27  ;;  %v1757_v34 = vcombine.low %v2543_v56, %v2593_v27 }
  0x3e   : > { %1957 = vmatprep.subr.bf16.mxu0 %v2154_v39  ;;  %v2610_v39 = vsel %vm2412_vm11, %v1737_v18, %v656_v28  ;;  %v432_v40 = vrot.slane %v430_v29, 7  ;;  %v1729_v41 = vcombine.high %v2593_v27, %v2593_v27 }
  0x3f   : > { %1233 = vmatprep.mubr.bf16.mxu0 %v2578_v19  ;;  %v596_v32 = vor.u32 %v595_v21, %v592_v20  ;;  %1306 = vmatprep.mubr.bf16.mxu1 %v1757_v34  ;;  %v2619_v47 = vcombine.low %v2582_v22, %v2610_v39  ;;  %v604_v50 = vshrl.u32 %v1728_v33, 16  ;;  %v607_v51 = vshll.u32 %v1728_v33, 16 }
  0x40   : > { %1998 = vmatpush3.bf16.msra.mxu1 %v2157_v1  ;;  %1234 = vmatmul.mubr.bf16.gmra.mxu0 %v2572_v63  ;;  %v435_v54 = vor.u32 %v433_v37, %v432_v40  ;;  %v613_v58 = vshll.u32 %v1729_v41, 16  ;;  %v1738_v60 = vrot.slane %v1728_v33, 9  ;;  %v660_v6 = vrot.slane %v1729_v41, 5 }
  0x41   : > { %1958 = vmatpush3.bf16.msra.mxu0 %v2156_v53  ;;  %1999 = vmatprep.subr.bf16.mxu1 %v2159_v10  ;;  %v597_v44 = vrot.slane %v596_v32, 4  ;;  %v2630_v53 = vsel %vm2361_vm5, %v463_v30, 0  ;;  %v606_v0 = vrot.slane %v604_v50, 4  ;;  %v609_v13 = vrot.slane %v607_v51, 5  ;;  %v2165_v30 = vld [vmem:[%s2796_s1 + $0x188] sm:$0xff]   ;;  %v2167_v10 = vld [vmem:[%s2796_s1 + $0x1c0] sm:$0xff]  }
  0x42   : > { %1959 = vmatprep.subr.bf16.mxu0 %v2158_v2  ;;  %1307 = vmatmul.mubr.bf16.gmra.mxu1 %v2619_v47  ;;  %v2647_v2 = vcombine.low %v2494_v9, %v2543_v56  ;;  %v462_v5 = vsel %vm2355_vm4, 0, %v435_v54  ;;  %v2666_v20 = vsel %vm2412_vm11, %v1738_v60, %v660_v6  ;;  %v2677_v32 = vcombine.low %v2630_v53, %v2630_v53  ;;  %v2171_v60 = vld [vmem:[%s2796_s1 + $0x230] sm:$0xff]  }
  0x43   : > { %v2637_v62 = vsel %vm2404_vm10, %v597_v44, %v601_v25  ;;  %v474_v7 = vsel %vm2361_vm5, %v462_v5, 0  ;;  %v610_v15 = vor.u32 %v609_v13, %v606_v0  ;;  %v1764_v0 = vcombine.low %v2530_v48, %v2582_v22 }
  0x44   : > { %v1749_v1 = vcombine.low %v2606_v38, %v2637_v62  ;;  %2000 = vmatpush3.bf16.msra.mxu1 %v2161_v36  ;;  %v1730_v11 = vcombine.low %v474_v7, %v474_v7  ;;  %v1731_v12 = vcombine.high %v474_v7, %v474_v7  ;;  %v1758_v9 = vcombine.low %v474_v7, %v2630_v53 }
  0x45   : > { %1960 = vmatpush3.bf16.msra.mxu0 %v2160_v57  ;;  %2001 = vmatprep.subr.bf16.mxu1 %v2163_v42  ;;  %v2170_v57 = vld [vmem:[%s2796_s1 + $0x238] sm:$0xff]   ;;  %v611_v8 = vrot.slane %v610_v15, 4  ;;  %v672_v41 = vshrl.u32 %v2677_v32, 16  ;;  %v675_v42 = vshll.u32 %v2677_v32, 16  ;;  %v1746_v50 = vcombine.low %v2593_v27, %v474_v7 }
  0x46   : > { %1961 = vmatprep.subr.bf16.mxu0 %v2162_v24  ;;  %1241 = vmatprep.mubr.bf16.mxu0 %v1749_v1  ;;  %v618_v56 = vshrl.u32 %v1730_v11, 16  ;;  %v621_v16 = vshll.u32 %v1730_v11, 16  ;;  %v627_v17 = vshll.u32 %v1731_v12, 16  ;;  %v1739_v18 = vrot.slane %v1730_v11, 9 }
  0x47   : > { %1314 = vmatprep.mubr.bf16.mxu1 %v1758_v9  ;;  %v664_v21 = vrot.slane %v1731_v12, 5  ;;  %v615_v24 = vrot.slane %v613_v58, 5  ;;  %v674_v54 = vrot.slane %v672_v41, 4  ;;  %v677_v58 = vrot.slane %v675_v42, 5 }
  0x48   : > { %1242 = vmatmul.mubr.bf16.gmra.mxu0 %v2647_v2  ;;  %2002 = vmatpush3.bf16.msra.mxu1 %v2165_v30  ;;  %v620_v25 = vrot.slane %v618_v56, 4  ;;  %v623_v28 = vrot.slane %v621_v16, 5  ;;  %v629_v34 = vrot.slane %v627_v17, 5  ;;  %v1760_v48 = vcombine.low %v2568_v59, %v2606_v38 }
  0x49   : > { %1962 = vmatpush3.bf16.msra.mxu0 %v2164_v52  ;;  %2003 = vmatprep.subr.bf16.mxu1 %v2167_v10  ;;  %v2673_v29 = vsel %vm2412_vm11, %v1739_v18, %v664_v21  ;;  %v2685_v37 = vsel %vm2404_vm10, %v611_v8, %v615_v24  ;;  %v1763_v52 = vcombine.low %v2448_v46, %v2482_v4  ;;  %v2172_v4 = vld [vmem:[%s2796_s1 + $0x228] sm:$0xff]  }
  0x4a   : > { %1963 = vmatprep.subr.bf16.mxu0 %v2166_v61  ;;  %v624_v33 = vor.u32 %v623_v28, %v620_v25  ;;  %v2681_v36 = vcombine.low %v2666_v20, %v2673_v29  ;;  %v678_v27 = vor.u32 %v677_v58, %v674_v54  ;;  %v1759_v46 = vcombine.low %v2430_v31, %v2559_v3  ;;  %v2174_v3 = vld [vmem:[%s2796_s1 + $0x218] sm:$0xff]  }
  0x4b   : > { %v1765_v22 = vcombine.low %v2610_v39, %v2666_v20  ;;  %v1761_v38 = vcombine.low %v2637_v62, %v2685_v37  ;;  %v1767_v6 = vcombine.low %v2630_v53, %v2370_v49 }
  0x4c   : > { %2004 = vmatpush3.bf16.msra.mxu1 %v2169_v45  ;;  %v625_v40 = vrot.slane %v624_v33, 4  ;;  %v679_v13 = vrot.slane %v678_v27, 4 }
  0x4d   : > { %1964 = vmatpush3.bf16.msra.mxu0 %v2168_v43  ;;  %1315 = vmatmul.mubr.bf16.gmra.mxu1 %v2681_v36 }
  0x4e   : > { %2041 = vmatprep.subr.bf16.mxu0 %v2170_v57  ;;  %2065 = vmatprep.subr.bf16.mxu1 %v2170_v57  ;;  %v2693_v44 = vsel %vm2404_vm10, %v625_v40, %v629_v34 }
  0x4f   : > { %1420 = vmatprep.mubr.bf16.mxu1 %v2578_v19  ;;  %v1750_v51 = vcombine.low %v2685_v37, %v2693_v44  ;;  %v1741_v19 = vcombine.high %v2630_v53, %v2630_v53 }
  0x51   : > { %1249 = vmatprep.mubr.bf16.mxu0 %v1750_v51  ;;  %v681_v61 = vshll.u32 %v1741_v19, 16 }
  0x52   : > { %1250 = vmatmul.mubr.bf16.gmra.mxu0 %v1746_v50 }
  0x53   : > { %1355 = vmatprep.mubr.bf16.mxu0 %v1763_v52  ;;  %v683_v30 = vrot.slane %v681_v61, 5 }
  0x55   : > { %1421 = vmatmul.mubr.bf16.vlgmr.msra.gmra.mxu1 %v2572_v63  ;;  %v2173_v63 = vld [vmem:[%s2796_s1 + $0x220] sm:$0xff]   ;;  %v684_v31 = vsel %vm2404_vm10, %v679_v13, %v683_v30 }
  0x56   : > { %2073 = vmatpush3.bf16.msra.mxu1 %v2170_v57  ;;  %1428 = vmatprep.mubr.bf16.mxu1 %v1749_v1  ;;  %v1742_v1 = vrot.slane %v2677_v32, 9  ;;  %v1768_v5 = vcombine.low %v684_v31, %v2418_v26  ;;  %v2176_v26 = vld [vmem:[%s2796_s1 + $0x208] sm:$0xff]   ;;  %v1762_v62 = vcombine.low %v2693_v44, %v684_v31 }
  0x57   : > { %2066 = vmatprep.subr.bf16.mxu1 %v2171_v60 }
  0x5a   : > { %2074 = vmatpush3.bf16.msra.mxu1 %v2171_v60  ;;  %1356 = vmatmul.mubr.bf16.vlgmr.msra.gmra.mxu0 %v1759_v46 }
  0x5b   : > { %2067 = vmatprep.subr.bf16.mxu1 %v2172_v4  ;;  %2042 = vmatpush3.bf16.msra.mxu0 %v2170_v57 }
  0x5c   : > { %1363 = vmatprep.mubr.bf16.mxu0 %v1764_v0  ;;  %2043 = vmatprep.subr.bf16.mxu0 %v2171_v60 }
  0x5d   : > { %1429 = vmatmul.mubr.bf16.gmra.mxu1 %v2647_v2  ;;  %v687_v2 = vrot.slane %v1741_v19, 5 }
  0x5e   : > { %2075 = vmatpush3.bf16.msra.mxu1 %v2172_v4  ;;  %1436 = vmatprep.mubr.bf16.mxu1 %v1750_v51 }
  0x5f   : > { %2068 = vmatprep.subr.bf16.mxu1 %v2173_v63  ;;  %2044 = vmatpush3.bf16.msra.mxu0 %v2171_v60  ;;  %v688_v59 = vsel %vm2412_vm11, %v1742_v1, %v687_v2 }
  0x60   : > { %2045 = vmatprep.subr.bf16.mxu0 %v2172_v4  ;;  %v1766_v39 = vcombine.low %v2673_v29, %v688_v59  ;;  %v1769_v49 = vcombine.low %v688_v59, %v2438_v35 }
  0x62   : > { %2076 = vmatpush3.bf16.msra.mxu1 %v2173_v63  ;;  %1364 = vmatmul.mubr.bf16.gmra.mxu0 %v1760_v48 }
  0x63   : > { %2069 = vmatprep.subr.bf16.mxu1 %v2174_v3  ;;  %2046 = vmatpush3.bf16.msra.mxu0 %v2172_v4 }
  0x64   : > { %1371 = vmatprep.mubr.bf16.mxu0 %v1765_v22  ;;  %2047 = vmatprep.subr.bf16.mxu0 %v2173_v63 }
  0x65   : > { %1437 = vmatmul.mubr.bf16.gmra.mxu1 %v1746_v50 }
  0x66   : > { %2077 = vmatpush3.bf16.msra.mxu1 %v2174_v3  ;;  %1444 = vmatprep.mubr.bf16.mxu1 %v1768_v5 }
  0x67   : > { %2070 = vmatprep.subr.bf16.mxu1 %v2175_v14  ;;  %2048 = vmatpush3.bf16.msra.mxu0 %v2173_v63 }
  0x68   : > { %2049 = vmatprep.subr.bf16.mxu0 %v2174_v3 }
  0x6a   : > { %2078 = vmatpush3.bf16.msra.mxu1 %v2175_v14  ;;  %1372 = vmatmul.mubr.bf16.gmra.mxu0 %v1761_v38 }
  0x6b   : > { %2071 = vmatprep.subr.bf16.mxu1 %v2176_v26  ;;  %2050 = vmatpush3.bf16.msra.mxu0 %v2174_v3 }
  0x6c   : > { %1379 = vmatprep.mubr.bf16.mxu0 %v1766_v39  ;;  %2051 = vmatprep.subr.bf16.mxu0 %v2175_v14 }
  0x6d   : > { %1445 = vmatmul.mubr.bf16.gmra.mxu1 %v1767_v6 }
  0x6e   : > { %2079 = vmatpush3.bf16.msra.mxu1 %v2176_v26  ;;  %2061 = vmatprep.mubr.bf16.mxu1 %v2681_v36 }
  0x6f   : > { %2072 = vmatprep.subr.bf16.mxu1 %v2177_v23  ;;  %2052 = vmatpush3.bf16.msra.mxu0 %v2175_v14 }
  0x70   : > { %2053 = vmatprep.subr.bf16.mxu0 %v2176_v26 }
  0x72   : > { %2080 = vmatpush3.bf16.msra.mxu1 %v2177_v23  ;;  %1380 = vmatmul.mubr.bf16.gmra.mxu0 %v1762_v62 }
  0x73   : > { %2054 = vmatpush3.bf16.msra.mxu0 %v2176_v26  ;;  %2057 = vmatprep.mubr.bf16.mxu0 %v2539_v55 }
  0x74   : > { %2055 = vmatprep.subr.bf16.mxu0 %v2177_v23 }
  0x75   : > { %2062 = vmatmul.mubr.bf16.vlgmr.msra.gmra.mxu1 %v1769_v49 }
  0x77   : > { %2056 = vmatpush3.bf16.msra.mxu0 %v2177_v23 }
  0x7a   : > { %2058 = vmatmul.mubr.bf16.vlgmr.msra.gmra.mxu0 %v2619_v47 }
  0xef   : > { %v1925_v53 = vpop.f32.mrf.mxu1 }
  0xf0   : > { %v1885_v7 = vpop.f32.mrf.mxu0 }
  0xf1   : > { %v1926_v10 = vpop.f32.mrf.mxu1 }
  0xf2   : > { %v2749_v11 = vadd.f32 %v1926_v10, %v1925_v53  ;;  %v1886_v15 = vpop.f32.mrf.mxu0 }
  0xf3   : > { %v2751_v12 = vpop.f32.mrf.mxu1  ;;  %v1887_v59 = vadd.f32 %v1886_v15, %v1885_v7 }
  0xf4   : > { %2807 = vst [vmem:[#allocation2_spill] sm:$0xff] %v2751_v12  ;;  %v1888_v9 = vpop.f32.mrf.mxu0 }
  0xf5   : > { %v2753_v35 = vpop.f32.mrf.mxu1 }
  0xf6   : > { %2808 = vst [vmem:[#allocation3_spill] sm:$0xff] %v2753_v35  ;;  %v1889_v45 = vpop.f32.mrf.mxu0 }
  0xfa   : > { %v2755_v43 = vpop.f32.mrf.mxu1 }
  0xfc   : > { %v1932_v55 = vpop.f32.mrf.mxu1 }
  0xfd   : > { %v1933_v35 = vadd.f32 %v1932_v55, %v2755_v43 }
  0xfe   : > { %v1934_v56 = vpop.f32.mrf.mxu1 }
 0x100   : > { %v1891_v16 = vpop.f32.mrf.mxu0  ;;  %v1935_v17 = vpop.f32.mrf.mxu1 }
 0x101   : > { %v1936_v12 = vadd.f32 %v1935_v17, %v1934_v56 }
 0x102   : > { %v1892_v18 = vpop.f32.mrf.mxu0  ;;  %v1937_v47 = vpop.f32.mrf.mxu1 }
 0x104   : > { %v1894_v20 = vpop.f32.mrf.mxu0  ;;  %v1938_v21 = vpop.f32.mrf.mxu1 }
 0x105   : > { %v1939_v62 = vadd.f32 %v1938_v21, %v1937_v47  ;;  %v2814_v47 = vld [vmem:[#allocation2_spill] sm:$0xff]  ;;  %v2815_v21 = vld [vmem:[#allocation3_spill] sm:$0xff] }
 0x106   : > { %v1895_v57 = vpop.f32.mrf.mxu0  ;;  %v1940_v8 = vpop.f32.mrf.mxu1 }
 0x108   : > { %v1897_v24 = vpop.f32.mrf.mxu0  ;;  %v1941_v28 = vpop.f32.mrf.mxu1 }
 0x109   : > { %v1942_v6 = vadd.f32 %v1941_v28, %v1940_v8 }
 0x10a   : > { %v1898_v25 = vpop.f32.mrf.mxu0 }
 0x10b   : > { %v1899_v23 = vadd.f32 %v1898_v25, %v1897_v24  ;;  %v1930_v25 = vadd.f32 %v2815_v21, %v2814_v47 }
 0x10c   : > { %v1900_v29 = vpop.f32.mrf.mxu0 }
 0x10d   : > { %v1943_v32 = vpop.f32.mrf.mxu1 }
 0x10e   : > { %v1901_v33 = vpop.f32.mrf.mxu0 }
 0x10f   : > { %v1944_v34 = vpop.f32.mrf.mxu1  ;;  %v1902_v39 = vadd.f32 %v1901_v33, %v1900_v29  ;;  %v1896_v33 = vadd.f32 %v1895_v57, %v1894_v20 }
 0x110   : > { %v1945_v53 = vadd.f32 %v1944_v34, %v1943_v32  ;;  %v1309_v32 = vadd.f32 %v1939_v62, %v1899_v23 }
 0x111   : > { %v1946_v36 = vpop.f32.mrf.mxu1  ;;  %v1312_v8 = vadd.f32 %v1942_v6, %v1902_v39 }
 0x112   : > { %v1903_v37 = vpop.f32.mrf.mxu0 }
 0x113   : > { %v1947_v40 = vpop.f32.mrf.mxu1 }
 0x114   : > { %v1904_v41 = vpop.f32.mrf.mxu0  ;;  %v1948_v24 = vadd.f32 %v1947_v40, %v1946_v36 }
 0x115   : > { %v2757_v42 = vpop.f32.mrf.mxu1  ;;  %v1905_v49 = vadd.f32 %v1904_v41, %v1903_v37 }
 0x116   : > { %2809 = vst [vmem:[#allocation4_spill] sm:$0xff] %v2757_v42  ;;  %v1906_v44 = vpop.f32.mrf.mxu0 }
 0x117   : > { %v2759_v50 = vpop.f32.mrf.mxu1  ;;  %v1317_v34 = vadd.f32 %v1945_v53, %v1905_v49 }
 0x118   : > { %2810 = vst [vmem:[#allocation5_spill] sm:$0xff] %v2759_v50  ;;  %v1907_v51 = vpop.f32.mrf.mxu0  ;;  %v1890_v50 = vadd.f32 %v1889_v45, %v1888_v9 }
 0x119   : > { %v2761_v52 = vpop.f32.mrf.mxu1  ;;  %v1908_v28 = vadd.f32 %v1907_v51, %v1906_v44  ;;  %v1304_v44 = vadd.f32 %v1936_v12, %v1896_v33 }
 0x11a   : > { %2811 = vst [vmem:[#allocation6_spill] sm:$0xff] %v2761_v52  ;;  %v1965_v19 = vpop.f32.mrf.mxu0  ;;  %v1293_v52 = vadd.f32 %v2749_v11, %v1887_v59 }
 0x11b   : > { %v2763_v54 = vpop.f32.mrf.mxu1  ;;  %v1320_v36 = vadd.f32 %v1948_v24, %v1908_v28 }
 0x11c   : > { %2812 = vst [vmem:[#allocation7_spill] sm:$0xff] %v2763_v54  ;;  %v1966_v58 = vpop.f32.mrf.mxu0 }
 0x11d   : > { %v2765_v60 = vpop.f32.mrf.mxu1  ;;  %v1967_v56 = vadd.f32 %v1966_v58, %v1965_v19  ;;  %v1296_v19 = vadd.f32 %v1930_v25, %v1890_v50 }
 0x11e   : > { %2813 = vst [vmem:[#allocation8_spill] sm:$0xff] %v2765_v60  ;;  %v1968_v27 = vpop.f32.mrf.mxu0  ;;  %v1893_v60 = vadd.f32 %v1892_v18, %v1891_v16 }
 0x11f   : > { %v2012_v61 = vpop.f32.mrf.mxu1  ;;  %v1358_v58 = vadd.f32 %v1967_v56, %v1293_v52 }
 0x120   : > { %v1969_v46 = vpop.f32.mrf.mxu0  ;;  %v1301_v55 = vadd.f32 %v1933_v35, %v1893_v60  ;;  %v2817_v60 = vld [vmem:[#allocation4_spill] sm:$0xff] }
 0x121   : > { %v2014_v4 = vpop.f32.mrf.mxu1 }
 0x122   : > { %v1971_v0 = vpop.f32.mrf.mxu0 }
 0x123   : > { %v2015_v13 = vpop.f32.mrf.mxu1 }
 0x124   : > { %v1972_v30 = vpop.f32.mrf.mxu0 }
 0x125   : > { %v2017_v63 = vpop.f32.mrf.mxu1  ;;  %v1973_v37 = vadd.f32 %v1972_v30, %v1971_v0  ;;  %v2816_v59 = vld [vmem:[#allocation8_spill] sm:$0xff]  ;;  %v2016_v30 = vadd.f32 %v2015_v13, %v2014_v4  ;;  %v2819_v4 = vld [vmem:[#allocation6_spill] sm:$0xff]  ;;  %v2820_v13 = vld [vmem:[#allocation7_spill] sm:$0xff] }
 0x126   : > { %v1974_v31 = vpop.f32.mrf.mxu0  ;;  %v2013_v0 = vadd.f32 %v2012_v61, %v2816_v59 }
 0x127   : > { %v2018_v48 = vpop.f32.mrf.mxu1 }
 0x128   : > { %v1975_v3 = vpop.f32.mrf.mxu0  ;;  %v2019_v41 = vadd.f32 %v2018_v48, %v2017_v63  ;;  %v2818_v63 = vld [vmem:[#allocation5_spill] sm:$0xff] }
 0x129   : > { %v2020_v22 = vpop.f32.mrf.mxu1  ;;  %v1976_v45 = vadd.f32 %v1975_v3, %v1974_v31  ;;  %v2007_v48 = vadd.f32 %v2818_v63, %v2817_v60 }
 0x12a   : > { %v1977_v1 = vpop.f32.mrf.mxu0 }
 0x12b   : > { %v2021_v2 = vpop.f32.mrf.mxu1  ;;  %v1423_v52 = vadd.f32 %v2007_v48, %v1358_v58 }
 0x12c   : > { %v1978_v5 = vpop.f32.mrf.mxu0  ;;  %v2022_v18 = vadd.f32 %v2021_v2, %v2020_v22 }
 0x12d   : > { %v2023_v14 = vpop.f32.mrf.mxu1  ;;  %v1979_v7 = vadd.f32 %v1978_v5, %v1977_v1  ;;  %v1970_v1 = vadd.f32 %v1969_v46, %v1968_v27  ;;  %v1366_v5 = vadd.f32 %v1973_v37, %v1301_v55 }
 0x12e   : > { %v1980_v38 = vpop.f32.mrf.mxu0 }
 0x12f   : > { %v2024_v26 = vpop.f32.mrf.mxu1  ;;  %v1374_v17 = vadd.f32 %v1979_v7, %v1309_v32  ;;  %v1361_v61 = vadd.f32 %v1970_v1, %v1296_v19 }
 0x130   : > { %v1981_v10 = vpop.f32.mrf.mxu0  ;;  %v2025_v51 = vadd.f32 %v2024_v26, %v2023_v14  ;;  %v2010_v26 = vadd.f32 %v2820_v13, %v2819_v4 }
 0x131   : > { %v2026_v54 = vpop.f32.mrf.mxu1  ;;  %v1982_v42 = vadd.f32 %v1981_v10, %v1980_v38  ;;  %v1439_v2 = vadd.f32 %v2019_v41, %v1374_v17 }
 0x132   : > { %v1983_v15 = vpop.f32.mrf.mxu0 }
 0x133   : > { %v2027_v29 = vpop.f32.mrf.mxu1  ;;  %v1377_v16 = vadd.f32 %v1982_v42, %v1312_v8  ;;  %v1369_v42 = vadd.f32 %v1976_v45, %v1304_v44  ;;  %v1426_v8 = vadd.f32 %v2010_v26, %v1361_v61 }
 0x134   : > { %v1984_v11 = vpop.f32.mrf.mxu0  ;;  %v2028_v22 = vadd.f32 %v2027_v29, %v2026_v54  ;;  %v1431_v54 = vadd.f32 %v2013_v0, %v1366_v5 }
 0x135   : > { %v2063_v9 = vpop.f32.mrf.mxu1  ;;  %v1985_v43 = vadd.f32 %v1984_v11, %v1983_v15  ;;  %v1442_v35 = vadd.f32 %v2022_v18, %v1377_v16  ;;  %v1434_v62 = vadd.f32 %v2016_v30, %v1369_v42 }
 0x136   : > { %v1986_v20 = vpop.f32.mrf.mxu0 }
 0x137   : > { %v1503_v57 = vpop.f32.mrf.mxu1  ;;  %v1382_v40 = vadd.f32 %v1985_v43, %v1317_v34 }
 0x138   : > { %v1987_v38 = vpop.f32.mrf.mxu0  ;;  %v1504_v23 = vadd.f32 %v1503_v57, %v1439_v2 }
 0x139   : > { %v2064_v31 = vpop.f32.mrf.mxu1  ;;  %v1988_v3 = vadd.f32 %v1987_v38, %v1986_v20  ;;  %v1447_v46 = vadd.f32 %v2025_v51, %v1382_v40 }
 0x13a   : > { %v2059_v12 = vpop.f32.mrf.mxu0  ;;  %v1551_v55 = vmul.f32 %v1504_v23, %v1504_v23 }
 0x13b   : > { %v1506_v39 = vpop.f32.mrf.mxu1  ;;  %v1385_v27 = vadd.f32 %v1988_v3, %v1320_v36  ;;  %v1496_v10 = vadd.f32 %v2059_v12, %v1431_v54  ;;  %v1512_v7 = vadd.f32 %v2063_v9, %v1447_v46 }
 0x13c   : > { %v1507_v14 = vadd.f32 %v1506_v39, %v1442_v35  ;;  %v1487_v6 = vpop.f32.mrf.mxu0 }
 0x13d   : > { %v1450_v50 = vadd.f32 %v2028_v22, %v1385_v27  ;;  %v1488_v33 = vadd.f32 %v1487_v6, %v1423_v52  ;;  %v1549_v11 = vmul.f32 %v1496_v10, %v1496_v10  ;;  %v1553_v44 = vmul.f32 %v1512_v7, %v1512_v7 }
 0x13e   : > { %v2060_v49 = vpop.f32.mrf.mxu0  ;;  %v1859_v53 = vpack.c.bf16 %v1507_v14, %v1504_v23  ;;  %v1552_v20 = vmul.f32 %v1507_v14, %v1507_v14 }
 0x13f   : > { %v1499_v15 = vadd.f32 %v2060_v49, %v1434_v62  ;;  %v1515_v29 = vadd.f32 %v2064_v31, %v1450_v50  ;;  %v1547_v25 = vmul.f32 %v1488_v33, %v1488_v33 }
 0x140   : > { %v1490_v28 = vpop.f32.mrf.mxu0  ;;  %1867 = vst [vmem:[%s219_s7 + $0x10] sm:$0xff] %v1859_v53  }
 0x141   : > { %v1854_v24 = vpack.c.bf16 %v1499_v15, %v1496_v10  ;;  %v1864_v47 = vpack.c.bf16 %v1515_v29, %v1512_v7  ;;  %v1491_v21 = vadd.f32 %v1490_v28, %v1426_v8  ;;  %v1550_v16 = vmul.f32 %v1499_v15, %v1499_v15 }
 0x142   : > { %v1554_v51 = vmul.f32 %v1515_v29, %v1515_v29 }
 0x143   : > { %1866 = vst [vmem:[%s219_s7 + $0x8] sm:$0xff] %v1854_v24   ;;  %1868 = vst [vmem:[%s219_s7 + $0x18] sm:$0xff] %v1864_v47   ;;  %v1849_v32 = vpack.c.bf16 %v1491_v21, %v1488_v33  ;;  %v1534_v34 = vadd.f32 %v1491_v21, %v1488_v33  ;;  %v1548_v37 = vmul.f32 %v1491_v21, %v1491_v21 }
 0x145   : > { %1850 = vst [vmem:[%s219_s7] sm:$0xff] %v1849_v32   ;;  %v1535_v9 = vadd.f32 %v1534_v34, %v1496_v10  ;;  %v1555_v45 = vadd.f32 %v1548_v37, %v1547_v25 }
 0x147   : > { %v1556_v18 = vadd.f32 %v1555_v45, %v1549_v11  ;;  %v1536_v43 = vadd.f32 %v1535_v9, %v1499_v15 }
 0x149   : > { %v1537_v56 = vadd.f32 %v1536_v43, %v1504_v23  ;;  %v1557_v17 = vadd.f32 %v1556_v18, %v1550_v16 }
 0x14b   : > { %v1538_v41 = vadd.f32 %v1537_v56, %v1507_v14  ;;  %v1558_v57 = vadd.f32 %v1557_v17, %v1551_v55 }
 0x14d   : > { %v1539_v36 = vadd.f32 %v1538_v41, %v1512_v7  ;;  %v1559_v40 = vadd.f32 %v1558_v57, %v1552_v20 }
 0x14f   : > { %v1540_v1 = vadd.f32 %v1539_v36, %v1515_v29  ;;  %v1560_v5 = vadd.f32 %v1559_v40, %v1553_v44 }
 0x151   : > { %v1541_v59 = vrot.slane %v1540_v1, 4  ;;  %v1561_v0 = vadd.f32 %v1560_v5, %v1554_v51 }
 0x153   : > { %v1542_v30 = vadd.f32 %v1541_v59, %v1540_v1  ;;  %v1562_v38 = vrot.slane %v1561_v0, 4 }
 0x155   : > { %v1543_v31 = vrot.slane %v1542_v30, 2  ;;  %v1563_v42 = vadd.f32 %v1562_v38, %v1561_v0 }
 0x157   : > { %v1544_v3 = vadd.f32 %v1543_v31, %v1542_v30  ;;  %v1564_v22 = vrot.slane %v1563_v42, 2 }
 0x159   : > { %v1545_v35 = vrot.slane %v1544_v3, 1  ;;  %v1565_v19 = vadd.f32 %v1564_v22, %v1563_v42 }
 0x15b   : > { %v1566_v58 = vrot.slane %v1565_v19, 1  ;;  %v1546_v60 = vadd.f32 %v1545_v35, %v1544_v3 }
 0x15d   : > { %v1567_v63 = vadd.f32 %v1566_v58, %v1565_v19 }
 0x15f   : > { %v1569_v48 = vsel %vm452_vm0, %v1546_v60, %v1567_v63 }
 0x160   : > { %1570 = vst [vmem:[%s226_s10] sm:$0x3] %v1569_v48 }
 0x161 PF: > { %s14_s14 = sadd.s32 1, %s2200_s14   ;;  %s2821_s12 = smov %s2196_s13 }
 0x162   : > { %p11_p5 = scmp.ge.s32.totalorder %s14_s14, 4   ;;  %s2822_s13 = smov %s2824_s15 }
 0x164   :  { %13 = sbr.rel (!%p11_p5) target bundleno = 2 (0x2), region = 73 }

// kernel: res_block_forward.6
= control target key start
LH: loop header
LB: loop body
LE: loop exit
PB: predicated region body
PF: predicated region fallthrough
CT: control target
= control target key end

     0   :  { %s2362_s18 = smov 0   ;;  %s2364_s19 = smov 0   ;;  %s2966_s0 = inlined_call_operand.vmem [shape: bf16[2,8,8,128], index: 0, kind: input, shape index: {}]   ;;  %s2967_s1 = inlined_call_operand.vmem [shape: f32[1,128], index: 1, kind: input, shape index: {}]   ;;  %s2968_s2 = inlined_call_operand.vmem [shape: f32[1,128], index: 2, kind: input, shape index: {}]   ;;  %s2969_s3 = inlined_call_operand.vmem [shape: bf16[1152,128], index: 3, kind: input, shape index: {}]   ;;  %s2970_s4 = inlined_call_operand.vmem [shape: bf16[2,8,8,128], index: 4, kind: output, shape index: {0}]   ;;  %s2971_s5 = inlined_call_operand.vmem [shape: f32[2,2,128], index: 5, kind: output, shape index: {1}]  }
   0x1   :  { %s2366_s20 = smov 0  }
   0x2 LB: > { %s25_s21 = sadd.s32 1, %s2325_s19  ;;  %p1818_p0 = scmp.ge.s32.totalorder %s2329_s20, 1  ;;  %s2329_s20 = sphi %s2366_s20, %s16_s20   ;;  %s2325_s19 = sphi %s2364_s19, %s2999_s19   ;;  %s2321_s18 = sphi %s2362_s18, %s2998_s18  }
   0x3   : > { %p26_p1 = scmp.ge.s32.totalorder %s25_s21, 2  ;;  %p215_p2 = scmp.lt.s32.totalorder %s2329_s20, 3 }
   0x5   : > { %s3001_s21 = smov (%p26_p1, %s25_s21), 0  ;;  %p216_p3 = pnand %p1818_p0, %p215_p2 }
   0x7   : > { %219 = sbr.rel (%p216_p3) target bundleno = 366 (0x16e), region = 36 }
   0xc   : > { %v2235_v0 = vld [vmem:[%s2969_s3 + $0xf8] sm:$0xff]   ;;  %v2239_v4 = vld [vmem:[%s2969_s3 + $0xf0] sm:$0xff]   ;;  %v2243_v8 = vld [vmem:[%s2969_s3 + $0xe8] sm:$0xff]   ;;  %p257_p4 = scmp.lt.s32.totalorder %s2321_s18, 1  ;;  %vm560_vm0 = vcmask 1040384   ;;  %v2331_v31 = vmov 0  }
   0xd   : > { %v2236_v1 = vld [vmem:[%s2969_s3 + $0xb8] sm:$0xff]   ;;  %2038 = vmatprep.subr.bf16.mxu1 %v2235_v0  ;;  %v2240_v5 = vld [vmem:[%s2969_s3 + $0xb0] sm:$0xff]   ;;  %v2244_v9 = vld [vmem:[%s2969_s3 + $0xa8] sm:$0xff]   ;;  %v491_v32 = vrot.slane %v2331_v31, 7  ;;  %vm572_vm1 = vcmask 1044480   ;;  %vm739_vm6 = vcmask 1042432  }
   0xe   : > { %v2237_v2 = vld [vmem:[%s2969_s3 + $0x78] sm:$0xff]   ;;  %2039 = vmatpush3.bf16.msra.mxu1 %v2236_v1  ;;  %v2241_v6 = vld [vmem:[%s2969_s3 + $0x70] sm:$0xff]   ;;  %v2245_v10 = vld [vmem:[%s2969_s3 + $0x68] sm:$0xff]   ;;  %s3003_s18 = smov (!%p257_p4, %s2321_s18), 1  ;;  %vm561_vm2 = vsmask.f32 256 }
   0xf   : > { %v2238_v3 = vld [vmem:[%s2969_s3 + $0x38] sm:$0xff]   ;;  %1998 = vmatprep.subr.bf16.mxu0 %v2237_v2  ;;  %2040 = vmatprep.subr.bf16.mxu1 %v2239_v4  ;;  %v2242_v7 = vld [vmem:[%s2969_s3 + $0x30] sm:$0xff]   ;;  %v2246_v11 = vld [vmem:[%s2969_s3 + $0x28] sm:$0xff]   ;;  %s1954_s7 = sshll.u32 %s3003_s18, 5  ;;  %vm573_vm3 = vsmask.f32 4352 }
  0x10   : > { %1999 = vmatpush3.bf16.msra.mxu0 %v2238_v3  ;;  %v2247_v12 = vld [vmem:[%s2969_s3 + $0xe0] sm:$0xff]   ;;  %v2251_v16 = vld [vmem:[%s2969_s3 + $0xd8] sm:$0xff]   ;;  %v2255_v20 = vld [vmem:[%s2969_s3 + $0xd0] sm:$0xff]   ;;  %s2479_s16 = scalar_lea.vmem %s2966_s0, %s1954_s7  ;;  %vm740_vm7 = vcmask 1046532   ;;  %vm624_vm8 = vsmask.f32 3328  ;;  %s273_s9 = scalar_lea.vmem %s2970_s4, %s1954_s7 }
  0x11   : > { %2000 = vmatprep.subr.bf16.mxu0 %v2241_v6  ;;  %v2248_v13 = vld [vmem:[%s2969_s3 + $0xa0] sm:$0xff]   ;;  %v2252_v17 = vld [vmem:[%s2969_s3 + $0x98] sm:$0xff]   ;;  %v2256_v21 = vld [vmem:[%s2969_s3 + $0x90] sm:$0xff]   ;;  %vm625_vm10 = vsmask.f32 7440  ;;  %s1823_s7 = sshll.u32 %s3003_s18, 1 }
  0x12   : > { %2041 = vmatpush3.bf16.msra.mxu1 %v2240_v5  ;;  %v2249_v14 = vld [vmem:[%s2969_s3 + $0x60] sm:$0xff]   ;;  %v2253_v18 = vld [vmem:[%s2969_s3 + $0x58] sm:$0xff]   ;;  %v2257_v22 = vld [vmem:[%s2969_s3 + $0x50] sm:$0xff]   ;;  %s280_s12 = scalar_lea.vmem %s2971_s5, %s1823_s7 }
  0x13   : > { %2042 = vmatprep.subr.bf16.mxu1 %v2243_v8  ;;  %v2250_v15 = vld [vmem:[%s2969_s3 + $0x20] sm:$0xff]   ;;  %v2254_v19 = vld [vmem:[%s2969_s3 + $0x18] sm:$0xff]   ;;  %v2258_v23 = vld [vmem:[%s2969_s3 + $0x10] sm:$0xff]  }
  0x14   : > { %2001 = vmatpush3.bf16.msra.mxu0 %v2242_v7  ;;  %v2259_v24 = vld [vmem:[%s2969_s3 + $0xc8] sm:$0xff]   ;;  %v2263_v28 = vld [vmem:[%s2969_s3 + $0xc0] sm:$0xff]   ;;  %vm2499_vm4 = vmand %vm560_vm0, %vm561_vm2 }
  0x15   : > { %2002 = vmatprep.subr.bf16.mxu0 %v2245_v10  ;;  %v2260_v25 = vld [vmem:[%s2969_s3 + $0x88] sm:$0xff]   ;;  %v2264_v29 = vld [vmem:[%s2969_s3 + $0x80] sm:$0xff]   ;;  %vm2508_vm5 = vmand %vm572_vm1, %vm573_vm3  ;;  %v563_v43 = vsel %vm2499_vm4, 0, %v491_v32 }
  0x16   : > { %2043 = vmatpush3.bf16.msra.mxu1 %v2244_v9  ;;  %v2261_v26 = vld [vmem:[%s2969_s3 + $0x48] sm:$0xff]   ;;  %v2265_v30 = vld [vmem:[%s2969_s3 + $0x40] sm:$0xff]   ;;  %v2516_v44 = vsel %vm2508_vm5, %v563_v43, 0  ;;  %v2267_v45 = vld [vmem:[%s2969_s3 + $0x1f8] sm:$0xff]  }
  0x17   : > { %2044 = vmatprep.subr.bf16.mxu1 %v2247_v12  ;;  %v2262_v27 = vld [vmem:[%s2969_s3 + $0x8] sm:$0xff]   ;;  %v1957_v33 = vld [vmem:[%s2479_s16] sm:$0xff]   ;;  %v1826_v48 = vcombine.low %v2516_v44, %v2516_v44  ;;  %v1994_v49 = vld [vmem:[%s2479_s16 + $0x18] sm:$0xff]   ;;  %v1827_v50 = vcombine.high %v2516_v44, %v2516_v44 }
  0x18   : > { %2003 = vmatpush3.bf16.msra.mxu0 %v2246_v11  ;;  %v2491_v34 = vld [vmem:[%s2967_s1] ss:$0 sm:$0xff]  ;;  %v1958_v36 = vunpack.c.l.bf16 %v1957_v33  ;;  %v1959_v37 = vunpack.c.h.bf16 %v1957_v33  ;;  %v1971_v51 = vunpack.c.h.bf16 %v1994_v49  ;;  %v2269_v52 = vld [vmem:[%s2969_s3 + $0x178] sm:$0xff]   ;;  %v1992_v5 = vld [vmem:[%s2479_s16 + $0x8] sm:$0xff]  }
  0x19   : > { %2004 = vmatprep.subr.bf16.mxu0 %v2249_v14  ;;  %v2496_v35 = vld [vmem:[%s2968_s2] ss:$0 sm:$0xff]  ;;  %v1842_v55 = vrot.slane %v1826_v48, 9  ;;  %v628_v57 = vshrl.u32 %v1826_v48, 16  ;;  %v631_v58 = vshll.u32 %v1826_v48, 16  ;;  %v744_v61 = vrot.slane %v1827_v50, 5  ;;  %vm2536_vm9 = vmor %vm739_vm6, %vm740_vm7 }
  0x1a   : > { %2045 = vmatpush3.bf16.msra.mxu1 %v2248_v13  ;;  %v2266_v39 = vld [vmem:[%s2969_s3] sm:$0xff]   ;;  %v305_v40 = vmul.f32 %v1958_v36, %v2491_v34  ;;  %v306_v41 = vmul.f32 %v1959_v37, %v2491_v34  ;;  %v312_v56 = vmul.f32 %v1971_v51, %v2491_v34  ;;  %v637_v7 = vshll.u32 %v1827_v50, 16  ;;  %vm2588_vm11 = vmor %vm624_vm8, %vm625_vm10 }
  0x1b   : > { %2046 = vmatprep.subr.bf16.mxu1 %v2251_v16  ;;  %v630_v63 = vrot.slane %v628_v57, 4  ;;  %v633_v0 = vrot.slane %v631_v58, 5  ;;  %v1962_v8 = vunpack.c.l.bf16 %v1992_v5  ;;  %v1963_v9 = vunpack.c.h.bf16 %v1992_v5  ;;  %v2305_v57 = vld [vmem:[%s2969_s3 + $0x208] sm:$0xff]  }
  0x1c   : > { %2005 = vmatpush3.bf16.msra.mxu0 %v2250_v15  ;;  %v320_v46 = vadd.f32 %v2496_v35, %v305_v40  ;;  %v321_v47 = vadd.f32 %v2496_v35, %v306_v41  ;;  %v327_v62 = vadd.f32 %v2496_v35, %v312_v56 }
  0x1d   : > { %2006 = vmatprep.subr.bf16.mxu0 %v2253_v18  ;;  %v634_v14 = vor.u32 %v633_v0, %v630_v63  ;;  %v307_v15 = vmul.f32 %v1962_v8, %v2491_v34  ;;  %v308_v16 = vmul.f32 %v1963_v9, %v2491_v34  ;;  %v2270_v9 = vld [vmem:[%s2969_s3 + $0x138] sm:$0xff]  }
  0x1e   : > { %2047 = vmatpush3.bf16.msra.mxu1 %v2252_v17  ;;  %v328_v53 = vmax.f32 %v320_v46, 0.0  ;;  %v329_v54 = vmax.f32 %v321_v47, 0.0  ;;  %v335_v6 = vmax.f32 %v327_v62, 0.0 }
  0x1f   : > { %2048 = vmatprep.subr.bf16.mxu1 %v2255_v20  ;;  %v322_v20 = vadd.f32 %v2496_v35, %v307_v15 }
  0x20   : > { %2007 = vmatpush3.bf16.msra.mxu0 %v2254_v19  ;;  %v336_v59 = vpack.c.bf16 %v328_v53, %v328_v53  ;;  %v337_v60 = vpack.c.bf16 %v329_v54, %v329_v54  ;;  %v343_v13 = vpack.c.bf16 %v335_v6, %v335_v6  ;;  %v2268_v53 = vld [vmem:[%s2969_s3 + $0x1b8] sm:$0xff]  }
  0x21   : > { %2008 = vmatprep.subr.bf16.mxu0 %v2257_v22 }
  0x22   : > { %2049 = vmatpush3.bf16.msra.mxu1 %v2256_v21  ;;  %v496_v1 = vshrl.u32 %v336_v59, 16  ;;  %v499_v2 = vshll.u32 %v336_v59, 16  ;;  %v503_v3 = vshrl.u32 %v337_v60, 16  ;;  %v506_v4 = vshll.u32 %v337_v60, 16  ;;  %v2271_v60 = vld [vmem:[%s2969_s3 + $0x1f0] sm:$0xff]  }
  0x23   : > { %2050 = vmatprep.subr.bf16.mxu1 %v2259_v24  ;;  %v545_v19 = vshrl.u32 %v343_v13, 16  ;;  %v1970_v21 = vunpack.c.l.bf16 %v1994_v49  ;;  %v2549_v24 = vsel %vm2536_vm9, %v1842_v55, %v744_v61  ;;  %v548_v33 = vshll.u32 %v343_v13, 16  ;;  %v2275_v13 = vld [vmem:[%s2969_s3 + $0x1e8] sm:$0xff]  }
  0x24   : > { %2009 = vmatpush3.bf16.msra.mxu0 %v2258_v23  ;;  %v498_v10 = vrot.slane %v496_v1, 7  ;;  %v505_v11 = vrot.slane %v503_v3, 7 }
  0x25   : > { %2010 = vmatprep.subr.bf16.mxu0 %v2261_v26  ;;  %v547_v37 = vrot.slane %v545_v19, 7  ;;  %v311_v40 = vmul.f32 %v1970_v21, %v2491_v34  ;;  %v2273_v19 = vld [vmem:[%s2969_s3 + $0x170] sm:$0xff]  }
  0x26   : > { %2051 = vmatpush3.bf16.msra.mxu1 %v2260_v25  ;;  %v501_v17 = vor.u32 %v499_v2, %v498_v10  ;;  %v508_v18 = vor.u32 %v506_v4, %v505_v11  ;;  %v639_v25 = vrot.slane %v637_v7, 5  ;;  %v2272_v7 = vld [vmem:[%s2969_s3 + $0x1b0] sm:$0xff]  }
  0x27   : > { %2052 = vmatprep.subr.bf16.mxu1 %v2263_v28  ;;  %v635_v28 = vrot.slane %v634_v14, 4  ;;  %v326_v61 = vadd.f32 %v2496_v35, %v311_v40  ;;  %v550_v62 = vor.u32 %v548_v33, %v547_v37  ;;  %v1993_v21 = vld [vmem:[%s2479_s16 + $0x10] sm:$0xff]  }
  0x28   : > { %2011 = vmatpush3.bf16.msra.mxu0 %v2262_v27  ;;  %v564_v22 = vsel %vm2499_vm4, 0, %v501_v17  ;;  %v565_v23 = vsel %vm2499_vm4, 0, %v508_v18  ;;  %v1967_v33 = vunpack.c.h.bf16 %v1993_v21 }
  0x29   : > { %2012 = vmatprep.subr.bf16.mxu0 %v2265_v30  ;;  %v2553_v26 = vsel %vm2508_vm5, %v564_v22, 0  ;;  %v2557_v27 = vsel %vm2508_vm5, %v565_v23, 0  ;;  %v2599_v5 = vsel %vm2588_vm11, %v635_v28, %v639_v25  ;;  %v334_v14 = vmax.f32 %v326_v61, 0.0 }
  0x2a   : > { %2053 = vmatpush3.bf16.msra.mxu1 %v2264_v29  ;;  %v323_v29 = vadd.f32 %v2496_v35, %v308_v16  ;;  %v1828_v30 = vcombine.low %v2553_v26, %v2553_v26  ;;  %v1829_v31 = vcombine.high %v2553_v26, %v2553_v26  ;;  %v2566_v32 = vcombine.low %v2557_v27, %v2557_v27 }
  0x2b   : > { %2118 = vmatprep.subr.bf16.mxu1 %v2267_v45  ;;  %v1865_v36 = vcombine.low %v2553_v26, %v2557_v27  ;;  %v2575_v51 = vcombine.high %v2557_v27, %v2557_v27  ;;  %v1853_v8 = vcombine.low %v2516_v44, %v2553_v26  ;;  %v571_v15 = vsel %vm2499_vm4, 0, %v550_v62  ;;  %v2283_v62 = vld [vmem:[%s2969_s3 + $0x1d8] sm:$0xff]  }
  0x2c   : > { %2013 = vmatpush3.bf16.msra.mxu0 %v2266_v39  ;;  %v330_v39 = vmax.f32 %v322_v20, 0.0  ;;  %v1843_v41 = vrot.slane %v1828_v30, 9  ;;  %v748_v43 = vrot.slane %v1829_v31, 5  ;;  %v642_v45 = vshrl.u32 %v1828_v30, 16  ;;  %v2276_v20 = vld [vmem:[%s2969_s3 + $0x1a8] sm:$0xff]  }
  0x2d   : > { %2078 = vmatprep.subr.bf16.mxu0 %v2269_v52  ;;  %v645_v46 = vshll.u32 %v1828_v30, 16  ;;  %1398 = vmatprep.mubr.bf16.mxu1 %v1865_v36  ;;  %v651_v47 = vshll.u32 %v1829_v31, 16  ;;  %v656_v48 = vshrl.u32 %v2566_v32, 16  ;;  %v659_v49 = vshll.u32 %v2566_v32, 16  ;;  %v2279_v30 = vld [vmem:[%s2969_s3 + $0x1e0] sm:$0xff]  }
  0x2e   : > { %v331_v50 = vmax.f32 %v323_v29, 0.0  ;;  %v2579_v52 = vsel %vm2536_vm9, %v1843_v41, %v748_v43  ;;  %v644_v54 = vrot.slane %v642_v45, 4  ;;  %v665_v1 = vshll.u32 %v2575_v51, 16  ;;  %v2274_v41 = vld [vmem:[%s2969_s3 + $0x130] sm:$0xff]  }
  0x2f   : > { %v647_v55 = vrot.slane %v645_v46, 5  ;;  %v1861_v56 = vcombine.low %v2549_v24, %v2579_v52  ;;  %v658_v58 = vrot.slane %v656_v48, 4  ;;  %v661_v59 = vrot.slane %v659_v49, 5  ;;  %v2277_v49 = vld [vmem:[%s2969_s3 + $0x168] sm:$0xff]  }
  0x30   : > { %v653_v0 = vrot.slane %v651_v47, 5  ;;  %v338_v3 = vpack.c.bf16 %v330_v39, %v330_v39  ;;  %v339_v4 = vpack.c.bf16 %v331_v50, %v331_v50  ;;  %v667_v17 = vrot.slane %v665_v1, 5  ;;  %v2280_v50 = vld [vmem:[%s2969_s3 + $0x1a0] sm:$0xff]  }
  0x31   : > { %v648_v63 = vor.u32 %v647_v55, %v644_v54  ;;  %1399 = vmatmul.mubr.bf16.vlgmr.msra.gmra.mxu1 %v1861_v56  ;;  %v662_v2 = vor.u32 %v661_v59, %v658_v58  ;;  %v1966_v31 = vunpack.c.l.bf16 %v1993_v21  ;;  %v2630_v36 = vpack.c.bf16 %v334_v14, %v334_v14  ;;  %v2278_v56 = vld [vmem:[%s2969_s3 + $0x128] sm:$0xff]   ;;  %v2284_v14 = vld [vmem:[%s2969_s3 + $0x198] sm:$0xff]  }
  0x32   : > { %2119 = vmatpush3.bf16.msra.mxu1 %v2268_v53  ;;  %v510_v10 = vshrl.u32 %v338_v3, 16  ;;  %v513_v11 = vshll.u32 %v338_v3, 16  ;;  %v517_v18 = vshrl.u32 %v339_v4, 16  ;;  %v520_v28 = vshll.u32 %v339_v4, 16 }
  0x33   : > { %v649_v6 = vrot.slane %v648_v63, 4  ;;  %2120 = vmatprep.subr.bf16.mxu1 %v2271_v60  ;;  %v663_v22 = vrot.slane %v662_v2, 4  ;;  %v1844_v39 = vrot.slane %v2566_v32, 9  ;;  %v752_v40 = vrot.slane %v2575_v51, 5 }
  0x34   : > { %v512_v25 = vrot.slane %v510_v10, 7  ;;  %v519_v26 = vrot.slane %v517_v18, 7  ;;  %v2639_v43 = vsel %vm2508_vm5, %v571_v15, 0  ;;  %v309_v46 = vmul.f32 %v1966_v31, %v2491_v34  ;;  %v2287_v15 = vld [vmem:[%s2969_s3 + $0x1d0] sm:$0xff]  }
  0x35   : > { %v2616_v16 = vsel %vm2588_vm11, %v649_v6, %v653_v0  ;;  %v2646_v47 = vsel %vm2588_vm11, %v663_v22, %v667_v17  ;;  %v310_v51 = vmul.f32 %v1967_v33, %v2491_v34  ;;  %v538_v58 = vshrl.u32 %v2630_v36, 16 }
  0x36   : > { %v1857_v23 = vcombine.low %v2599_v5, %v2616_v16  ;;  %2121 = vmatpush3.bf16.msra.mxu1 %v2272_v7  ;;  %v515_v29 = vor.u32 %v513_v11, %v512_v25  ;;  %v522_v37 = vor.u32 %v520_v28, %v519_v26  ;;  %v2681_v60 = vsel %vm2536_vm9, %v1844_v39, %v752_v40  ;;  %v2281_v7 = vld [vmem:[%s2969_s3 + $0x160] sm:$0xff]   ;;  %v2288_v28 = vld [vmem:[%s2969_s3 + $0x190] sm:$0xff]  }
  0x37   : > { %2122 = vmatprep.subr.bf16.mxu1 %v2275_v13  ;;  %v324_v61 = vadd.f32 %v2496_v35, %v309_v46  ;;  %v325_v4 = vadd.f32 %v2496_v35, %v310_v51  ;;  %v2282_v35 = vld [vmem:[%s2969_s3 + $0x120] sm:$0xff]   ;;  %v540_v21 = vrot.slane %v538_v58, 7 }
  0x38   : > { %1333 = vmatprep.mubr.bf16.mxu0 %v1857_v23  ;;  %v566_v45 = vsel %vm2499_vm4, 0, %v515_v29  ;;  %v567_v32 = vsel %vm2499_vm4, 0, %v522_v37 }
  0x39   : > { %1334 = vmatmul.mubr.bf16.vlgmr.msra.gmra.mxu0 %v1853_v8  ;;  %v2652_v48 = vsel %vm2508_vm5, %v566_v45, 0  ;;  %v2663_v53 = vsel %vm2508_vm5, %v567_v32, 0  ;;  %v332_v6 = vmax.f32 %v324_v61, 0.0  ;;  %v541_v8 = vshll.u32 %v2630_v36, 16  ;;  %v2291_v36 = vld [vmem:[%s2969_s3 + $0x1c8] sm:$0xff]   ;;  %v2289_v61 = vld [vmem:[%s2969_s3 + $0x150] sm:$0xff]  }
  0x3a   : > { %2079 = vmatpush3.bf16.msra.mxu0 %v2270_v9  ;;  %2123 = vmatpush3.bf16.msra.mxu1 %v2276_v20  ;;  %v1832_v54 = vcombine.low %v2652_v48, %v2652_v48  ;;  %v1833_v55 = vcombine.high %v2652_v48, %v2652_v48  ;;  %v2675_v34 = vcombine.low %v2663_v53, %v2663_v53  ;;  %v333_v18 = vmax.f32 %v325_v4, 0.0  ;;  %v2285_v20 = vld [vmem:[%s2969_s3 + $0x158] sm:$0xff]   ;;  %v2295_v4 = vld [vmem:[%s2969_s3 + $0x1c0] sm:$0xff]  }
  0x3b   : > { %2080 = vmatprep.subr.bf16.mxu0 %v2273_v19  ;;  %2124 = vmatprep.subr.bf16.mxu1 %v2279_v30  ;;  %v1866_v59 = vcombine.low %v2652_v48, %v2663_v53  ;;  %v1835_v13 = vcombine.high %v2663_v53, %v2663_v53  ;;  %v340_v19 = vpack.c.bf16 %v332_v6, %v332_v6 }
  0x3c   : > { %v1845_v63 = vrot.slane %v1832_v54, 9  ;;  %v756_v0 = vrot.slane %v1833_v55, 5  ;;  %v670_v1 = vshrl.u32 %v1832_v54, 16  ;;  %v673_v2 = vshll.u32 %v1832_v54, 16 }
  0x3d   : > { %1406 = vmatprep.mubr.bf16.mxu1 %v1866_v59  ;;  %v679_v3 = vshll.u32 %v1833_v55, 16  ;;  %v684_v25 = vshrl.u32 %v2675_v34, 16  ;;  %v687_v26 = vshll.u32 %v2675_v34, 16  ;;  %v341_v29 = vpack.c.bf16 %v333_v18, %v333_v18  ;;  %v2296_v18 = vld [vmem:[%s2969_s3 + $0x180] sm:$0xff]  }
  0x3e   : > { %2081 = vmatpush3.bf16.msra.mxu0 %v2274_v41  ;;  %v2694_v9 = vsel %vm2536_vm9, %v1845_v63, %v756_v0  ;;  %v672_v10 = vrot.slane %v670_v1, 4  ;;  %v675_v11 = vrot.slane %v673_v2, 5  ;;  %2125 = vmatpush3.bf16.msra.mxu1 %v2280_v50  ;;  %v524_v30 = vshrl.u32 %v340_v19, 16  ;;  %v2286_v50 = vld [vmem:[%s2969_s3 + $0x118] sm:$0xff]  }
  0x3f   : > { %2082 = vmatprep.subr.bf16.mxu0 %v2277_v49  ;;  %v2709_v17 = vcombine.low %v2681_v60, %v2694_v9  ;;  %2126 = vmatprep.subr.bf16.mxu1 %v2283_v62  ;;  %v681_v23 = vrot.slane %v679_v3, 5  ;;  %v527_v31 = vshll.u32 %v340_v19, 16  ;;  %v1846_v33 = vrot.slane %v2675_v34, 9  ;;  %v2290_v3 = vld [vmem:[%s2969_s3 + $0x110] sm:$0xff]  }
  0x40   : > { %v676_v22 = vor.u32 %v675_v11, %v672_v10  ;;  %v760_v39 = vrot.slane %v1835_v13, 5  ;;  %v686_v40 = vrot.slane %v684_v25, 4  ;;  %v689_v41 = vrot.slane %v687_v26, 5  ;;  %v2293_v11 = vld [vmem:[%s2969_s3 + $0x148] sm:$0xff]  }
  0x41   : > { %1407 = vmatmul.mubr.bf16.gmra.mxu1 %v2709_v17  ;;  %v526_v45 = vrot.slane %v524_v30, 7  ;;  %v531_v46 = vshrl.u32 %v341_v29, 16  ;;  %v534_v32 = vshll.u32 %v341_v29, 16  ;;  %v693_v49 = vshll.u32 %v1835_v13, 16 }
  0x42   : > { %2083 = vmatpush3.bf16.msra.mxu0 %v2278_v56  ;;  %v677_v37 = vrot.slane %v676_v22, 4  ;;  %2127 = vmatpush3.bf16.msra.mxu1 %v2284_v14  ;;  %v2733_v54 = vcombine.low %v2557_v27, %v2652_v48  ;;  %v690_v55 = vor.u32 %v689_v41, %v686_v40  ;;  %v543_v56 = vor.u32 %v541_v8, %v540_v21  ;;  %v2292_v48 = vld [vmem:[%s2969_s3 + $0x188] sm:$0xff]   ;;  %v2794_v22 = vld [vmem:[%s2969_s3 + $0x238] sm:$0xff]  }
  0x43   : > { %2084 = vmatprep.subr.bf16.mxu0 %v2281_v7  ;;  %2128 = vmatprep.subr.bf16.mxu1 %v2287_v15  ;;  %v529_v34 = vor.u32 %v527_v31, %v526_v45  ;;  %v533_v59 = vrot.slane %v531_v46, 7  ;;  %v2744_v62 = vcombine.low %v2639_v43, %v2639_v43  ;;  %v2754_v1 = vrot.slane %v693_v49, 5  ;;  %v2294_v40 = vld [vmem:[%s2969_s3 + $0x108] sm:$0xff]   ;;  %v2297_v49 = vld [vmem:[%s2969_s3 + $0x140] sm:$0xff]  }
  0x44   : > { %v2729_v51 = vsel %vm2588_vm11, %v677_v37, %v681_v23  ;;  %v570_v27 = vsel %vm2499_vm4, 0, %v543_v56  ;;  %v2771_v7 = vsel %vm2536_vm9, %v1846_v33, %v760_v39  ;;  %v691_v8 = vrot.slane %v690_v55, 4 }
  0x45   : > { %v2737_v58 = vcombine.low %v2646_v47, %v2729_v51  ;;  %v536_v63 = vor.u32 %v534_v32, %v533_v59  ;;  %v568_v0 = vsel %vm2499_vm4, 0, %v529_v34  ;;  %v2758_v2 = vsel %vm2508_vm5, %v570_v27, 0 }
  0x46   : > { %2085 = vmatpush3.bf16.msra.mxu0 %v2282_v35  ;;  %2129 = vmatpush3.bf16.msra.mxu1 %v2288_v28  ;;  %v580_v6 = vsel %vm2508_vm5, %v568_v0, 0  ;;  %v1840_v10 = vcombine.low %v2758_v2, %v2758_v2  ;;  %v1868_v15 = vcombine.low %v2758_v2, %v2639_v43 }
  0x47   : > { %2086 = vmatprep.subr.bf16.mxu0 %v2285_v20  ;;  %1341 = vmatprep.mubr.bf16.mxu0 %v2737_v58  ;;  %v569_v13 = vsel %vm2499_vm4, 0, %v536_v63  ;;  %v1836_v35 = vcombine.low %v580_v6, %v580_v6  ;;  %v1837_v14 = vcombine.high %v580_v6, %v580_v6  ;;  %v1841_v20 = vcombine.high %v2758_v2, %v2758_v2 }
  0x48   : > { %2130 = vmatprep.subr.bf16.mxu1 %v2291_v36  ;;  %1342 = vmatmul.mubr.bf16.gmra.mxu0 %v2733_v54  ;;  %v2787_v19 = vsel %vm2508_vm5, %v569_v13, 0  ;;  %v1849_v38 = vrot.slane %v1840_v10, 9  ;;  %v726_v21 = vshrl.u32 %v1840_v10, 16  ;;  %v1851_v63 = vcombine.high %v2639_v43, %v2639_v43 }
  0x49   : > { %v1838_v23 = vcombine.low %v2787_v19, %v2787_v19  ;;  %v1867_v25 = vcombine.low %v580_v6, %v2787_v19  ;;  %v1847_v42 = vrot.slane %v1836_v35, 9  ;;  %v764_v26 = vrot.slane %v1837_v14, 5 }
  0x4a   : > { %2087 = vmatpush3.bf16.msra.mxu0 %v2286_v50  ;;  %2131 = vmatpush3.bf16.msra.mxu1 %v2292_v48  ;;  %v698_v28 = vshrl.u32 %v1836_v35, 16  ;;  %v701_v29 = vshll.u32 %v1836_v35, 16  ;;  %v707_v30 = vshll.u32 %v1837_v14, 16  ;;  %v1839_v31 = vcombine.high %v2787_v19, %v2787_v19 }
  0x4b   : > { %2088 = vmatprep.subr.bf16.mxu0 %v2289_v61  ;;  %2132 = vmatprep.subr.bf16.mxu1 %v2295_v4  ;;  %v2803_v33 = vsel %vm2536_vm9, %v1847_v42, %v764_v26  ;;  %v1848_v36 = vrot.slane %v1838_v23, 9  ;;  %v772_v37 = vrot.slane %v1841_v20, 5  ;;  %v712_v39 = vshrl.u32 %v1838_v23, 16 }
  0x4c   : > { %1414 = vmatprep.mubr.bf16.mxu1 %v1867_v25  ;;  %v2810_v41 = vcombine.low %v2771_v7, %v2803_v33  ;;  %v700_v45 = vrot.slane %v698_v28, 4  ;;  %v703_v46 = vrot.slane %v701_v29, 5  ;;  %v709_v32 = vrot.slane %v707_v30, 5 }
  0x4d   : > { %v768_v50 = vrot.slane %v1839_v31, 5  ;;  %v2817_v55 = vsel %vm2536_vm9, %v1849_v38, %v772_v37  ;;  %v714_v56 = vrot.slane %v712_v39, 4  ;;  %v715_v34 = vshll.u32 %v1838_v23, 16  ;;  %v2300_v39 = vld [vmem:[%s2969_s3 + $0x230] sm:$0xff]  }
  0x4e   : > { %2089 = vmatpush3.bf16.msra.mxu0 %v2290_v3  ;;  %2133 = vmatpush3.bf16.msra.mxu1 %v2296_v18  ;;  %v704_v59 = vor.u32 %v703_v46, %v700_v45  ;;  %v721_v61 = vshll.u32 %v1839_v31, 16  ;;  %v728_v27 = vrot.slane %v726_v21, 4  ;;  %v729_v48 = vshll.u32 %v1840_v10, 16 }
  0x4f   : > { %2090 = vmatprep.subr.bf16.mxu0 %v2293_v11  ;;  %2194 = vmatprep.subr.bf16.mxu1 %v2794_v22  ;;  %v2825_v0 = vsel %vm2536_vm9, %v1848_v36, %v768_v50  ;;  %v717_v3 = vrot.slane %v715_v34, 5  ;;  %v735_v4 = vshll.u32 %v1841_v20, 16  ;;  %v2298_v11 = vld [vmem:[%s2969_s3 + $0x100] sm:$0xff]   ;;  %v2833_v13 = vsel %vm2588_vm11, %v691_v8, %v2754_v1 }
  0x50   : > { %1415 = vmatmul.mubr.bf16.gmra.mxu1 %v2810_v41  ;;  %v705_v10 = vrot.slane %v704_v59, 4  ;;  %v1855_v35 = vcombine.low %v2663_v53, %v580_v6  ;;  %v731_v14 = vrot.slane %v729_v48, 5  ;;  %v723_v20 = vrot.slane %v721_v61, 5 }
  0x51   : > { %1422 = vmatprep.mubr.bf16.mxu1 %v1868_v15  ;;  %v2838_v15 = vcombine.low %v2825_v0, %v2817_v55  ;;  %v718_v18 = vor.u32 %v717_v3, %v714_v56  ;;  %v737_v38 = vrot.slane %v735_v4, 5  ;;  %v1852_v1 = vrot.slane %v2744_v62, 9 }
  0x52   : > { %2091 = vmatpush3.bf16.msra.mxu0 %v2294_v40  ;;  %v2842_v21 = vsel %vm2588_vm11, %v705_v10, %v709_v32  ;;  %v732_v23 = vor.u32 %v731_v14, %v728_v27  ;;  %v795_v8 = vrot.slane %v1851_v63, 5  ;;  %v780_v30 = vshrl.u32 %v2744_v62, 16  ;;  %v2304_v32 = vld [vmem:[%s2969_s3 + $0x210] sm:$0xff]  }
  0x53   : > { %2092 = vmatprep.subr.bf16.mxu0 %v2297_v49  ;;  %v1859_v53 = vcombine.low %v2833_v13, %v2842_v21  ;;  %v719_v6 = vrot.slane %v718_v18, 4  ;;  %v783_v31 = vshll.u32 %v2744_v62, 16  ;;  %v1856_v36 = vcombine.low %v2787_v19, %v2758_v2  ;;  %v2306_v49 = vld [vmem:[%s2969_s3 + $0x200] sm:$0xff]  }
  0x54   : > { %v733_v25 = vrot.slane %v732_v23, 4  ;;  %v2850_v42 = vsel %vm2536_vm9, %v1852_v1, %v795_v8  ;;  %v1873_v37 = vcombine.low %v2579_v52, %v2681_v60  ;;  %v782_v40 = vrot.slane %v780_v30, 4 }
  0x55   : > { %1349 = vmatprep.mubr.bf16.mxu0 %v1859_v53  ;;  %v2854_v26 = vsel %vm2588_vm11, %v719_v6, %v723_v20  ;;  %v1879_v28 = vcombine.low %v2850_v42, %v2549_v24  ;;  %v785_v45 = vrot.slane %v783_v31, 5  ;;  %v789_v52 = vshll.u32 %v1851_v63, 16 }
  0x56   : > { %2093 = vmatpush3.bf16.msra.mxu0 %v2298_v11  ;;  %v2861_v29 = vsel %vm2588_vm11, %v733_v25, %v737_v38  ;;  %v1869_v60 = vcombine.low %v2616_v16, %v2646_v47  ;;  %v1874_v2 = vcombine.low %v2694_v9, %v2771_v7  ;;  %v2303_v16 = vld [vmem:[%s2969_s3 + $0x218] sm:$0xff]   ;;  %v1870_v9 = vcombine.low %v2729_v51, %v2833_v13 }
  0x57   : > { %2170 = vmatprep.subr.bf16.mxu0 %v2794_v22  ;;  %1350 = vmatmul.mubr.bf16.gmra.mxu0 %v1855_v35  ;;  %v1860_v12 = vcombine.low %v2854_v26, %v2861_v29  ;;  %v786_v62 = vor.u32 %v785_v45, %v782_v40  ;;  %v791_v46 = vrot.slane %v789_v52, 5  ;;  %v1875_v7 = vcombine.low %v2803_v33, %v2825_v0 }
  0x58   : > { %1423 = vmatmul.mubr.bf16.gmra.mxu1 %v2838_v15  ;;  %v1871_v51 = vcombine.low %v2842_v21, %v2854_v26  ;;  %v1876_v33 = vcombine.low %v2817_v55, %v2850_v42 }
  0x59   : > { %1528 = vmatprep.mubr.bf16.mxu1 %v2737_v58  ;;  %1357 = vmatprep.mubr.bf16.mxu0 %v1860_v12  ;;  %v2301_v58 = vld [vmem:[%s2969_s3 + $0x228] sm:$0xff]   ;;  %v787_v19 = vrot.slane %v786_v62, 4 }
  0x5b   : > { %v792_v47 = vsel %vm2588_vm11, %v787_v19, %v791_v46 }
  0x5f   : > { %1358 = vmatmul.mubr.bf16.gmra.mxu0 %v1856_v36 }
  0x60   : > { %1529 = vmatmul.mubr.bf16.vlgmr.msra.gmra.mxu1 %v2733_v54  ;;  %1463 = vmatprep.mubr.bf16.mxu0 %v1873_v37  ;;  %v2302_v54 = vld [vmem:[%s2969_s3 + $0x220] sm:$0xff]  }
  0x61   : > { %2202 = vmatpush3.bf16.msra.mxu1 %v2794_v22  ;;  %1536 = vmatprep.mubr.bf16.mxu1 %v1859_v53 }
  0x62   : > { %2195 = vmatprep.subr.bf16.mxu1 %v2300_v39 }
  0x65   : > { %2203 = vmatpush3.bf16.msra.mxu1 %v2300_v39 }
  0x66   : > { %2196 = vmatprep.subr.bf16.mxu1 %v2301_v58 }
  0x67   : > { %1464 = vmatmul.mubr.bf16.vlgmr.msra.gmra.mxu0 %v1869_v60 }
  0x68   : > { %1537 = vmatmul.mubr.bf16.gmra.mxu1 %v1855_v35  ;;  %2171 = vmatpush3.bf16.msra.mxu0 %v2794_v22  ;;  %v1878_v22 = vcombine.low %v792_v47, %v2599_v5  ;;  %v1877_v5 = vcombine.low %v2639_v43, %v2516_v44  ;;  %v1872_v44 = vcombine.low %v2861_v29, %v792_v47 }
  0x69   : > { %2204 = vmatpush3.bf16.msra.mxu1 %v2301_v58  ;;  %2172 = vmatprep.subr.bf16.mxu0 %v2300_v39 }
  0x6a   : > { %1471 = vmatprep.mubr.bf16.mxu0 %v1874_v2  ;;  %2197 = vmatprep.subr.bf16.mxu1 %v2302_v54 }
  0x6b   : > { %1544 = vmatprep.mubr.bf16.mxu1 %v1860_v12 }
  0x6c   : > { %2173 = vmatpush3.bf16.msra.mxu0 %v2300_v39 }
  0x6d   : > { %2205 = vmatpush3.bf16.msra.mxu1 %v2302_v54  ;;  %2174 = vmatprep.subr.bf16.mxu0 %v2301_v58 }
  0x6e   : > { %2198 = vmatprep.subr.bf16.mxu1 %v2303_v16 }
  0x6f   : > { %1472 = vmatmul.mubr.bf16.gmra.mxu0 %v1870_v9 }
  0x70   : > { %1545 = vmatmul.mubr.bf16.gmra.mxu1 %v1856_v36  ;;  %2175 = vmatpush3.bf16.msra.mxu0 %v2301_v58 }
  0x71   : > { %2206 = vmatpush3.bf16.msra.mxu1 %v2303_v16  ;;  %2176 = vmatprep.subr.bf16.mxu0 %v2302_v54 }
  0x72   : > { %1479 = vmatprep.mubr.bf16.mxu0 %v1875_v7  ;;  %2199 = vmatprep.subr.bf16.mxu1 %v2304_v32 }
  0x73   : > { %1552 = vmatprep.mubr.bf16.mxu1 %v1878_v22 }
  0x74   : > { %2177 = vmatpush3.bf16.msra.mxu0 %v2302_v54 }
  0x75   : > { %2207 = vmatpush3.bf16.msra.mxu1 %v2304_v32  ;;  %2178 = vmatprep.subr.bf16.mxu0 %v2303_v16 }
  0x76   : > { %2200 = vmatprep.subr.bf16.mxu1 %v2305_v57 }
  0x77   : > { %1480 = vmatmul.mubr.bf16.gmra.mxu0 %v1871_v51 }
  0x78   : > { %1553 = vmatmul.mubr.bf16.gmra.mxu1 %v1877_v5  ;;  %2179 = vmatpush3.bf16.msra.mxu0 %v2303_v16 }
  0x79   : > { %2208 = vmatpush3.bf16.msra.mxu1 %v2305_v57  ;;  %2180 = vmatprep.subr.bf16.mxu0 %v2304_v32 }
  0x7a   : > { %1487 = vmatprep.mubr.bf16.mxu0 %v1876_v33  ;;  %2201 = vmatprep.subr.bf16.mxu1 %v2306_v49 }
  0x7b   : > { %2190 = vmatprep.mubr.bf16.mxu1 %v2838_v15 }
  0x7c   : > { %2181 = vmatpush3.bf16.msra.mxu0 %v2304_v32 }
  0x7d   : > { %2209 = vmatpush3.bf16.msra.mxu1 %v2306_v49  ;;  %2182 = vmatprep.subr.bf16.mxu0 %v2305_v57 }
  0x7f   : > { %1488 = vmatmul.mubr.bf16.gmra.mxu0 %v1872_v44 }
  0x80   : > { %2191 = vmatmul.mubr.bf16.vlgmr.msra.gmra.mxu1 %v1879_v28  ;;  %2183 = vmatpush3.bf16.msra.mxu0 %v2305_v57 }
  0x81   : > { %2186 = vmatprep.mubr.bf16.mxu0 %v2709_v17  ;;  %2184 = vmatprep.subr.bf16.mxu0 %v2306_v49 }
  0x84   : > { %2185 = vmatpush3.bf16.msra.mxu0 %v2306_v49 }
  0x87   : > { %2187 = vmatmul.mubr.bf16.vlgmr.msra.gmra.mxu0 %v2810_v41 }
  0xf1   : > { %v2054_v43 = vpop.f32.mrf.mxu1 }
  0xf3   : > { %v2055_v50 = vpop.f32.mrf.mxu1 }
  0xf4   : > { %v2920_v55 = vadd.f32 %v2055_v50, %v2054_v43 }
  0xf5   : > { %v2057_v56 = vpop.f32.mrf.mxu1 }
  0xf6   : > { %2980 = vst [vmem:[#allocation2_spill] sm:$0xff] %v2920_v55 }
  0xf7   : > { %v2058_v34 = vpop.f32.mrf.mxu1 }
  0xf8   : > { %v2922_v59 = vadd.f32 %v2058_v34, %v2057_v56 }
  0xf9   : > { %v2014_v61 = vpop.f32.mrf.mxu0 }
  0xfa   : > { %2981 = vst [vmem:[#allocation3_spill] sm:$0xff] %v2922_v59 }
  0xfb   : > { %v2015_v27 = vpop.f32.mrf.mxu0 }
  0xfc   : > { %v2016_v50 = vadd.f32 %v2015_v27, %v2014_v61 }
  0xfd   : > { %v2924_v48 = vpop.f32.mrf.mxu0  ;;  %v2989_v61 = vld [vmem:[#allocation2_spill] sm:$0xff] }
  0xfe   : > { %2982 = vst [vmem:[#allocation4_spill] sm:$0xff] %v2924_v48  ;;  %v1401_v27 = vadd.f32 %v2989_v61, %v2016_v50 }
  0xff   : > { %v2926_v63 = vpop.f32.mrf.mxu0 }
 0x100   : > { %2983 = vst [vmem:[#allocation5_spill] sm:$0xff] %v2926_v63 }
 0x101   : > { %v2060_v24 = vpop.f32.mrf.mxu1 }
 0x103   : > { %v2061_v17 = vpop.f32.mrf.mxu1 }
 0x104   : > { %v2062_v56 = vadd.f32 %v2061_v17, %v2060_v24 }
 0x105   : > { %v2063_v3 = vpop.f32.mrf.mxu1 }
 0x107   : > { %v2064_v41 = vpop.f32.mrf.mxu1 }
 0x108   : > { %v2020_v0 = vpop.f32.mrf.mxu0  ;;  %v2065_v48 = vadd.f32 %v2064_v41, %v2063_v3 }
 0x10a   : > { %v2021_v4 = vpop.f32.mrf.mxu0 }
 0x10b   : > { %v2022_v34 = vadd.f32 %v2021_v4, %v2020_v0 }
 0x10c   : > { %v2023_v11 = vpop.f32.mrf.mxu0 }
 0x10e   : > { %v2024_v35 = vpop.f32.mrf.mxu0 }
 0x10f   : > { %v2025_v55 = vadd.f32 %v2024_v35, %v2023_v11 }
 0x110   : > { %v2066_v13 = vpop.f32.mrf.mxu1 }
 0x111   : > { %v1412_v11 = vadd.f32 %v2065_v48, %v2025_v55 }
 0x112   : > { %v2067_v10 = vpop.f32.mrf.mxu1 }
 0x113   : > { %v2068_v57 = vadd.f32 %v2067_v10, %v2066_v13 }
 0x114   : > { %v2069_v14 = vpop.f32.mrf.mxu1 }
 0x116   : > { %v2070_v15 = vpop.f32.mrf.mxu1 }
 0x117   : > { %v2026_v18 = vpop.f32.mrf.mxu0  ;;  %v2071_v5 = vadd.f32 %v2070_v15, %v2069_v14 }
 0x118   : > { %v2072_v20 = vpop.f32.mrf.mxu1 }
 0x119   : > { %v2027_v38 = vpop.f32.mrf.mxu0 }
 0x11a   : > { %v2073_v21 = vpop.f32.mrf.mxu1  ;;  %v2028_v51 = vadd.f32 %v2027_v38, %v2026_v18 }
 0x11b   : > { %v2029_v23 = vpop.f32.mrf.mxu0 }
 0x11c   : > { %v2075_v1 = vpop.f32.mrf.mxu1 }
 0x11d   : > { %v2030_v8 = vpop.f32.mrf.mxu0 }
 0x11e   : > { %v2076_v53 = vpop.f32.mrf.mxu1  ;;  %v2031_v33 = vadd.f32 %v2030_v8, %v2029_v23 }
 0x11f   : > { %v2032_v6 = vpop.f32.mrf.mxu0  ;;  %v2077_v10 = vadd.f32 %v2076_v53, %v2075_v1 }
 0x120   : > { %v2928_v25 = vpop.f32.mrf.mxu1  ;;  %v1420_v59 = vadd.f32 %v2071_v5, %v2031_v33 }
 0x121   : > { %2984 = vst [vmem:[#allocation6_spill] sm:$0xff] %v2928_v25  ;;  %v2033_v42 = vpop.f32.mrf.mxu0  ;;  %v1417_v25 = vadd.f32 %v2068_v57, %v2028_v51 }
 0x122   : > { %v2930_v26 = vpop.f32.mrf.mxu1 }
 0x123   : > { %2985 = vst [vmem:[#allocation7_spill] sm:$0xff] %v2930_v26  ;;  %v2035_v28 = vpop.f32.mrf.mxu0 }
 0x124   : > { %v2932_v29 = vpop.f32.mrf.mxu1 }
 0x125   : > { %2986 = vst [vmem:[#allocation8_spill] sm:$0xff] %v2932_v29  ;;  %v2036_v12 = vpop.f32.mrf.mxu0 }
 0x126   : > { %v2934_v30 = vpop.f32.mrf.mxu1  ;;  %v2037_v13 = vadd.f32 %v2036_v12, %v2035_v28 }
 0x127   : > { %2987 = vst [vmem:[#allocation9_spill] sm:$0xff] %v2934_v30  ;;  %v2094_v31 = vpop.f32.mrf.mxu0  ;;  %v2074_v30 = vadd.f32 %v2073_v21, %v2072_v20  ;;  %v2990_v20 = vld [vmem:[#allocation4_spill] sm:$0xff]  ;;  %v2991_v21 = vld [vmem:[#allocation5_spill] sm:$0xff] }
 0x128   : > { %v2140_v36 = vpop.f32.mrf.mxu1  ;;  %v1428_v35 = vadd.f32 %v2077_v10, %v2037_v13 }
 0x129   : > { %v2095_v37 = vpop.f32.mrf.mxu0 }
 0x12a   : > { %v2141_v39 = vpop.f32.mrf.mxu1  ;;  %v2096_v1 = vadd.f32 %v2095_v37, %v2094_v31  ;;  %v2993_v31 = vld [vmem:[#allocation3_spill] sm:$0xff]  ;;  %v2994_v37 = vld [vmem:[#allocation6_spill] sm:$0xff] }
 0x12b   : > { %v2097_v40 = vpop.f32.mrf.mxu0  ;;  %v2142_v53 = vadd.f32 %v2141_v39, %v2140_v36  ;;  %v2995_v39 = vld [vmem:[#allocation7_spill] sm:$0xff] }
 0x12c   : > { %v2936_v45 = vpop.f32.mrf.mxu1 }
 0x12d   : > { %2988 = vst [vmem:[#allocation10_spill] sm:$0xff] %v2936_v45  ;;  %v2098_v58 = vpop.f32.mrf.mxu0  ;;  %v2034_v45 = vadd.f32 %v2033_v42, %v2032_v6  ;;  %v2019_v6 = vadd.f32 %v2991_v21, %v2990_v20  ;;  %v1409_v42 = vadd.f32 %v2062_v56, %v2022_v34 }
 0x12e   : > { %v2144_v62 = vpop.f32.mrf.mxu1 }
 0x12f   : > { %v2100_v52 = vpop.f32.mrf.mxu0  ;;  %v1425_v3 = vadd.f32 %v2074_v30, %v2034_v45  ;;  %v1404_v36 = vadd.f32 %v2993_v31, %v2019_v6 }
 0x130   : > { %v2146_v60 = vpop.f32.mrf.mxu1 }
 0x131   : > { %v2101_v2 = vpop.f32.mrf.mxu0 }
 0x132   : > { %v2147_v54 = vpop.f32.mrf.mxu1  ;;  %v2102_v24 = vadd.f32 %v2101_v2, %v2100_v52  ;;  %v2099_v52 = vadd.f32 %v2098_v58, %v2097_v40 }
 0x133   : > { %v2103_v19 = vpop.f32.mrf.mxu0  ;;  %v2148_v15 = vadd.f32 %v2147_v54, %v2146_v60 }
 0x134   : > { %v2149_v46 = vpop.f32.mrf.mxu1  ;;  %v1474_v60 = vadd.f32 %v2102_v24, %v1409_v42  ;;  %v2992_v2 = vld [vmem:[#allocation10_spill] sm:$0xff]  ;;  %v1469_v57 = vadd.f32 %v2099_v52, %v1404_v36 }
 0x135   : > { %v2104_v16 = vpop.f32.mrf.mxu0  ;;  %v2145_v54 = vadd.f32 %v2144_v62, %v2992_v2 }
 0x136   : > { %v2150_v47 = vpop.f32.mrf.mxu1  ;;  %v2105_v17 = vadd.f32 %v2104_v16, %v2103_v19  ;;  %v1539_v5 = vadd.f32 %v2142_v53, %v1474_v60 }
 0x137   : > { %v2106_v9 = vpop.f32.mrf.mxu0  ;;  %v2151_v23 = vadd.f32 %v2150_v47, %v2149_v46  ;;  %v2136_v47 = vadd.f32 %v2995_v39, %v2994_v37 }
 0x138   : > { %v2152_v7 = vpop.f32.mrf.mxu1  ;;  %v1477_v19 = vadd.f32 %v2105_v17, %v1412_v11 }
 0x139   : > { %v2107_v22 = vpop.f32.mrf.mxu0 }
 0x13a   : > { %v2153_v32 = vpop.f32.mrf.mxu1  ;;  %v2108_v43 = vadd.f32 %v2107_v22, %v2106_v9  ;;  %v1466_v9 = vadd.f32 %v2096_v1, %v1401_v27  ;;  %v2996_v22 = vld [vmem:[#allocation8_spill] sm:$0xff] }
 0x13b   : > { %v2109_v49 = vpop.f32.mrf.mxu0 }
 0x13c   : > { %v2155_v44 = vpop.f32.mrf.mxu1  ;;  %v1482_v38 = vadd.f32 %v2108_v43, %v1417_v25 }
 0x13d   : > { %v2110_v29 = vpop.f32.mrf.mxu0 }
 0x13e   : > { %v2156_v26 = vpop.f32.mrf.mxu1  ;;  %v2111_v63 = vadd.f32 %v2110_v29, %v2109_v49  ;;  %v2154_v29 = vadd.f32 %v2153_v32, %v2152_v7  ;;  %v1542_v49 = vadd.f32 %v2145_v54, %v1477_v19 }
 0x13f   : > { %v2112_v18 = vpop.f32.mrf.mxu0  ;;  %v2157_v30 = vadd.f32 %v2156_v26, %v2155_v44  ;;  %v2997_v26 = vld [vmem:[#allocation9_spill] sm:$0xff]  ;;  %v1531_v44 = vadd.f32 %v2136_v47, %v1466_v9 }
 0x140   : > { %v2192_v14 = vpop.f32.mrf.mxu1  ;;  %v1485_v8 = vadd.f32 %v2111_v63, %v1420_v59  ;;  %v1547_v63 = vadd.f32 %v2148_v15, %v1482_v38  ;;  %v2139_v32 = vadd.f32 %v2997_v26, %v2996_v22 }
 0x141   : > { %v2113_v0 = vpop.f32.mrf.mxu0 }
 0x142   : > { %v1611_v4 = vpop.f32.mrf.mxu1  ;;  %v2114_v41 = vadd.f32 %v2113_v0, %v2112_v18  ;;  %v1550_v12 = vadd.f32 %v2151_v23, %v1485_v8  ;;  %v1534_v18 = vadd.f32 %v2139_v32, %v1469_v57 }
 0x143   : > { %v2115_v28 = vpop.f32.mrf.mxu0  ;;  %v1612_v55 = vadd.f32 %v1611_v4, %v1547_v63 }
 0x144   : > { %v2193_v25 = vpop.f32.mrf.mxu1  ;;  %v1490_v59 = vadd.f32 %v2114_v41, %v1425_v3 }
 0x145   : > { %v2116_v46 = vpop.f32.mrf.mxu0  ;;  %v1659_v42 = vmul.f32 %v1612_v55, %v1612_v55 }
 0x146   : > { %v1614_v16 = vpop.f32.mrf.mxu1  ;;  %v2117_v45 = vadd.f32 %v2116_v46, %v2115_v28  ;;  %v1555_v40 = vadd.f32 %v2154_v29, %v1490_v59 }
 0x147   : > { %v1615_v48 = vadd.f32 %v1614_v16, %v1550_v12  ;;  %v2188_v7 = vpop.f32.mrf.mxu0 }
 0x148   : > { %v1493_v58 = vadd.f32 %v2117_v45, %v1428_v35  ;;  %v1620_v50 = vadd.f32 %v2192_v14, %v1555_v40  ;;  %v1604_v56 = vadd.f32 %v2188_v7, %v1539_v5 }
 0x149   : > { %v1985_v62 = vpack.c.bf16 %v1615_v48, %v1612_v55  ;;  %v1595_v51 = vpop.f32.mrf.mxu0  ;;  %v1660_v11 = vmul.f32 %v1615_v48, %v1615_v48 }
 0x14a   : > { %v1558_v33 = vadd.f32 %v2157_v30, %v1493_v58  ;;  %v1596_v13 = vadd.f32 %v1595_v51, %v1531_v44  ;;  %v1657_v0 = vmul.f32 %v1604_v56, %v1604_v56  ;;  %v1661_v53 = vmul.f32 %v1620_v50, %v1620_v50 }
 0x14b   : > { %1996 = vst [vmem:[%s273_s9 + $0x10] sm:$0xff] %v1985_v62   ;;  %v2189_v43 = vpop.f32.mrf.mxu0 }
 0x14c   : > { %v1623_v34 = vadd.f32 %v2193_v25, %v1558_v33  ;;  %v1607_v10 = vadd.f32 %v2189_v43, %v1542_v49  ;;  %v1655_v61 = vmul.f32 %v1596_v13, %v1596_v13 }
 0x14d   : > { %v1598_v15 = vpop.f32.mrf.mxu0 }
 0x14e   : > { %v1990_v38 = vpack.c.bf16 %v1623_v34, %v1620_v50  ;;  %v1980_v23 = vpack.c.bf16 %v1607_v10, %v1604_v56  ;;  %v1599_v8 = vadd.f32 %v1598_v15, %v1534_v18  ;;  %v1658_v14 = vmul.f32 %v1607_v10, %v1607_v10 }
 0x14f   : > { %v1662_v29 = vmul.f32 %v1623_v34, %v1623_v34 }
 0x150   : > { %1997 = vst [vmem:[%s273_s9 + $0x18] sm:$0xff] %v1990_v38   ;;  %1995 = vst [vmem:[%s273_s9 + $0x8] sm:$0xff] %v1980_v23   ;;  %v1975_v27 = vpack.c.bf16 %v1599_v8, %v1596_v13  ;;  %v1642_v24 = vadd.f32 %v1599_v8, %v1596_v13  ;;  %v1656_v17 = vmul.f32 %v1599_v8, %v1599_v8 }
 0x152   : > { %1976 = vst [vmem:[%s273_s9] sm:$0xff] %v1975_v27   ;;  %v1643_v4 = vadd.f32 %v1642_v24, %v1604_v56  ;;  %v1663_v20 = vadd.f32 %v1656_v17, %v1655_v61 }
 0x154   : > { %v1644_v21 = vadd.f32 %v1643_v4, %v1607_v10  ;;  %v1664_v6 = vadd.f32 %v1663_v20, %v1657_v0 }
 0x156   : > { %v1645_v3 = vadd.f32 %v1644_v21, %v1612_v55  ;;  %v1665_v41 = vadd.f32 %v1664_v6, %v1658_v14 }
 0x158   : > { %v1646_v35 = vadd.f32 %v1645_v3, %v1615_v48  ;;  %v1666_v1 = vadd.f32 %v1665_v41, %v1659_v42 }
 0x15a   : > { %v1647_v28 = vadd.f32 %v1646_v35, %v1620_v50  ;;  %v1667_v25 = vadd.f32 %v1666_v1, %v1660_v11 }
 0x15c   : > { %v1648_v59 = vadd.f32 %v1647_v28, %v1623_v34  ;;  %v1668_v63 = vadd.f32 %v1667_v25, %v1661_v53 }
 0x15e   : > { %v1649_v12 = vrot.slane %v1648_v59, 4  ;;  %v1669_v52 = vadd.f32 %v1668_v63, %v1662_v29 }
 0x160   : > { %v1650_v60 = vadd.f32 %v1649_v12, %v1648_v59  ;;  %v1670_v2 = vrot.slane %v1669_v52, 4 }
 0x162   : > { %v1651_v54 = vrot.slane %v1650_v60, 2  ;;  %v1671_v19 = vadd.f32 %v1670_v2, %v1669_v52 }
 0x164   : > { %v1652_v46 = vadd.f32 %v1651_v54, %v1650_v60  ;;  %v1672_v16 = vrot.slane %v1671_v19, 2 }
 0x166   : > { %v1653_v30 = vrot.slane %v1652_v46, 1  ;;  %v1673_v45 = vadd.f32 %v1672_v16, %v1671_v19 }
 0x168   : > { %v1674_v55 = vrot.slane %v1673_v45, 1  ;;  %v1654_v48 = vadd.f32 %v1653_v30, %v1652_v46 }
 0x16a   : > { %v1675_v31 = vadd.f32 %v1674_v55, %v1673_v45 }
 0x16c   : > { %v1677_v36 = vsel %vm560_vm0, %v1654_v48, %v1675_v31 }
 0x16d   : > { %1678 = vst [vmem:[%s280_s12] sm:$0x3] %v1677_v36 }
 0x16e PF: > { %s16_s20 = sadd.s32 1, %s2329_s20   ;;  %s2998_s18 = smov %s2325_s19 }
 0x16f   : > { %p13_p5 = scmp.ge.s32.totalorder %s16_s20, 4   ;;  %s2999_s19 = smov %s3001_s21 }
 0x171   :  { %15 = sbr.rel (!%p13_p5) target bundleno = 2 (0x2), region = 81 }

</bundles_post_ra>
